<compile_context>
chip_gen: v6e
topology: v6e:2x2x1
jax: 0.10.0
libtpu: 0.0.40
codegen_flags: <defaults>
</compile_context>

<pallas_src>
import functools

import jax
import jax.numpy as jnp
from jax import lax
from jax.experimental import pallas as pl
from jax.experimental.pallas import tpu as pltpu

EPS = 1e-5  # nn.BatchNorm2d default


# ----------------------------- in-kernel helpers --------------------------- #

def _bn(y, g_ref, b_ref, *, relu):
    """Training-mode BatchNorm over the lane (= N*H*W position) axis.

    One-pass biased statistics (var = E[y^2] - mean^2), matching nn.BatchNorm2d
    in training mode.  `y` is (C_out, M); gamma/beta refs are (C_out, 1).
    """
    m = jnp.mean(y, axis=1, keepdims=True)
    v = jnp.mean(y * y, axis=1, keepdims=True) - m * m
    y = (y - m) * lax.rsqrt(v + EPS) * g_ref[...] + b_ref[...]
    return jnp.maximum(y, 0.0) if relu else y


def _conv1x1(x, w_ref):
    """1x1 conv in (C, M) layout: a plain matmul over the channel axis."""
    return jnp.dot(w_ref[...], x, preferred_element_type=jnp.float32)


def _conv3x3(y, w2_ref, masks, *, row_w, m_tot):
    """3x3 / pad=1 / stride=1 conv in (C, M) layout.

    Each tap is a static lane-roll of the flattened (n, h, w) axis plus a
    border-validity mask; the 9 masked taps are stacked along the
    sublane-aligned channel axis and applied with ONE K = 9*Cm matmul.
    """
    taps = []
    for dy in range(3):
        for dx in range(3):
            off = (dy - 1) * row_w + (dx - 1)
            t = y if off == 0 else pltpu.roll(y, shift=(-off) % m_tot, axis=1)
            if not (dy == 1 and dx == 1):            # centre tap always valid
                idx = dy * 3 + dx
                t = t * masks[idx:idx + 1, :]
            taps.append(t)
    stacked = jnp.concatenate(taps, axis=0)          # (9*Cm, M), tile-aligned
    return jnp.dot(w2_ref[...], stacked, preferred_element_type=jnp.float32)


def _subsample(y, rowid_ref, src_ref):
    """Stride-2 spatial subsample via an in-register one-hot matmul."""
    sel = (rowid_ref[...] == src_ref[...]).astype(jnp.float32)   # (M, Mo)
    return jnp.dot(y, sel, preferred_element_type=jnp.float32)


def _bneck_resnet(x, prm, masks, *, row_w, m_tot):
    """conv1x1 -> conv3x3(s1,p1) -> conv1x1 -> +x -> ReLU (BN after each conv)."""
    w1, g1, b1, w2, g2, b2, w3, g3, b3 = prm
    y = _bn(_conv1x1(x, w1), g1, b1, relu=True)
    y = _bn(_conv3x3(y, w2, masks, row_w=row_w, m_tot=m_tot), g2, b2, relu=True)
    y = _bn(_conv1x1(y, w3), g3, b3, relu=False)
    return jnp.maximum(y + x, 0.0)


def _bneck_down(x, prm, masks, rowid_ref, src_ref, *, row_w, m_tot):
    """conv1x1 -> conv3x3(s2,p1) -> conv1x1, all with BN + ReLU."""
    w1, g1, b1, w2, g2, b2, w3, g3, b3 = prm
    y = _bn(_conv1x1(x, w1), g1, b1, relu=True)
    y = _conv3x3(y, w2, masks, row_w=row_w, m_tot=m_tot)   # stride-1 taps
    y = _subsample(y, rowid_ref, src_ref)                  # keep even (h, w)
    y = _bn(y, g2, b2, relu=True)                          # stats over strided M
    y = _bn(_conv1x1(y, w3), g3, b3, relu=True)
    return y


def _make_myblock_kernel(*, n, h, w, repeat, is_first):
    """One kernel for the whole MyBlock forward (all `repeat` bottlenecks)."""
    ho, wo = (h - 1) // 2 + 1, (w - 1) // 2 + 1     # k=3, s=2, p=1 output size
    m_full, m_half = n * h * w, n * ho * wo
    need_down = not is_first
    need_half = need_down and repeat > 1

    def kernel(*refs):
        refs = list(refs)
        o_ref = refs.pop()                                        # output last
        x_ref = refs.pop(0)
        b1 = [refs.pop(0) for _ in range(9)]                      # resnet params
        b2 = [refs.pop(0) for _ in range(9)] if need_down else None
        masks_full = refs.pop(0)[...]                             # (9, m_full)
        rowid_ref = refs.pop(0) if need_down else None            # (m_full, 1)
        src_ref = refs.pop(0) if need_down else None              # (1, m_half)
        masks_half = refs.pop(0)[...] if need_half else None      # (9, m_half)
        assert not refs

        x = x_ref[...]
        if is_first:
            for _ in range(repeat):
                x = _bneck_resnet(x, b1, masks_full, row_w=w, m_tot=m_full)
        else:
            x = _bneck_down(x, b2, masks_full, rowid_ref, src_ref,
                            row_w=w, m_tot=m_full)
            for _ in range(repeat - 1):
                x = _bneck_resnet(x, b1, masks_half, row_w=wo, m_tot=m_half)
        o_ref[...] = x

    return kernel


# ------------------------------ host-side prep ------------------------------ #

def _prep_1x1(w, *, out_pad=None, in_pad=None):
    w = w.reshape(w.shape[0], w.shape[1]).astype(jnp.float32)   # (out_c, in_c)
    if out_pad is not None:
        w = jnp.pad(w, ((0, out_pad - w.shape[0]), (0, 0)))
    if in_pad is not None:
        w = jnp.pad(w, ((0, 0), (0, in_pad - w.shape[1])))
    return w


def _prep_3x3(w, cpad):
    out_c, in_c = w.shape[0], w.shape[1]
    taps = jnp.transpose(w, (2, 3, 0, 1)).reshape(9, out_c, in_c)
    taps = jnp.pad(taps, ((0, 0), (0, cpad - out_c), (0, cpad - in_c)))
    # (cpad, 9*cpad): column block t holds the (out, in) matrix of tap t.
    return jnp.transpose(taps, (1, 0, 2)).reshape(cpad, 9 * cpad).astype(jnp.float32)


def _prep_vec(v, pad=None):
    v = v.reshape(-1, 1).astype(jnp.float32)
    if pad is not None:
        v = jnp.pad(v, ((0, pad - v.shape[0]), (0, 0)))
    return v


def _prep_bottleneck(p, cpad, keys):
    """[w1,g1,b1, w2,g2,b2, w3,g3,b3] in the kernel's (C, M) matmul layouts.

    Conv biases are intentionally dropped: they are exactly cancelled by the
    BatchNorm mean subtraction that always follows each conv.
    """
    s1, s2, s3 = (p[k] for k in keys)
    return [
        _prep_1x1(s1["w"], out_pad=cpad), _prep_vec(s1["gamma"], cpad), _prep_vec(s1["beta"], cpad),
        _prep_3x3(s2["w"], cpad),         _prep_vec(s2["gamma"], cpad), _prep_vec(s2["beta"], cpad),
        _prep_1x1(s3["w"], in_pad=cpad),  _prep_vec(s3["gamma"]),       _prep_vec(s3["beta"]),
    ]


def _tap_masks(n, h, w):
    """(9, n*h*w) f32 border-validity masks for the 3x3 taps (t = dy*3 + dx)."""
    m = jnp.arange(n * h * w)
    hh = (m // w) % h
    ww = m % w
    rows = []
    for dy in range(3):
        for dx in range(3):
            rows.append((hh + dy - 1 >= 0) & (hh + dy - 1 < h)
                        & (ww + dx - 1 >= 0) & (ww + dx - 1 < w))
    return jnp.stack(rows).astype(jnp.float32)


def _down_src(n, h, w, ho, wo):
    """(1, n*ho*wo) int32 flat source index of each stride-2 output position."""
    r = jnp.arange(n * ho * wo)
    nn = r // (ho * wo)
    rem = r % (ho * wo)
    yo, xo = rem // wo, rem % wo
    return ((nn * h + 2 * yo) * w + 2 * xo).astype(jnp.int32).reshape(1, -1)


def _full_spec(shape):
    return pl.BlockSpec(shape, lambda i: (0,) * len(shape))


@functools.partial(jax.jit, static_argnames=("repeat", "is_first"))
def myblock_forward(x_nchw, params, *, repeat, is_first):
    n, c, h, w = x_nchw.shape
    cm = c // 4
    cpad = max(8, -(-cm // 8) * 8)                # pad mid channels to sublane multiple
    ho, wo = (h - 1) // 2 + 1, (w - 1) // 2 + 1
    m_full, m_half = n * h * w, n * ho * wo
    need_down = not is_first
    need_half = need_down and repeat > 1

    assert m_full % 128 == 0, "roll-based 3x3 assumes flattened spatial axis is a lane multiple"
    if need_half:
        assert m_half % 128 == 0, "roll-based 3x3 assumes flattened spatial axis is a lane multiple"

    # (C, M) lane-dense layout: channels on sublanes, all spatial positions on lanes.
    x2d = jnp.transpose(x_nchw, (1, 0, 2, 3)).reshape(c, m_full).astype(jnp.float32)

    args = [x2d]
    args += _prep_bottleneck(params["block1"], cpad,
                             ("conv1x1_1", "conv3x3_s1", "conv1x1_2"))
    if need_down:
        args += _prep_bottleneck(params["block2"], cpad,
                                 ("conv1x1_1", "download", "download_conv"))
    args.append(_tap_masks(n, h, w))
    if need_down:
        args.append(jnp.arange(m_full, dtype=jnp.int32).reshape(-1, 1))
        args.append(_down_src(n, h, w, ho, wo))
    if need_half:
        args.append(_tap_masks(n, ho, wo))

    m_out = m_half if need_down else m_full

    # Everything (activations + weights + masks) stays VMEM-resident for the
    # whole block; guard loudly so it never outgrows v5e's 16 MiB scoped VMEM.
    total_bytes = sum(int(a.size) * a.dtype.itemsize for a in args) + m_out * c * 4
    assert total_bytes < 4 * 1024 * 1024, "MyBlock too large for single-block VMEM residency"
    # TODO(synk): for large N*H*W, tile the M (lane) axis with a 'parallel' grid
    # axis (uses both v7x TensorCores) and switch BatchNorm to two-pass stats
    # (per-tile sum/sum-sq scratch + finalize); cast matmul operands to bf16.

    kernel = _make_myblock_kernel(n=n, h=h, w=w, repeat=repeat, is_first=is_first)
    out = pl.pallas_call(
        kernel,
        out_shape=jax.ShapeDtypeStruct((c, m_out), jnp.float32),
        grid=(1,),
        in_specs=[_full_spec(a.shape) for a in args],
        out_specs=_full_spec((c, m_out)),
        compiler_params=pltpu.CompilerParams(dimension_semantics=("arbitrary",)),
    )(*args)

    oh, ow = (ho, wo) if need_down else (h, w)
    return jnp.transpose(out.reshape(c, n, oh, ow), (1, 0, 2, 3))   # -> NCHW


# --------------------------- parameter init -------------------------------- #

def init_conv_params(key, in_c, out_c, k):
    k1, k2 = jax.random.split(key)
    fan_in = in_c * k * k
    bound = 1.0 / jnp.sqrt(jnp.float32(fan_in))
    return {
        "w": jax.random.uniform(k1, (out_c, in_c, k, k), jnp.float32, -bound, bound),
        "b": jax.random.uniform(k2, (out_c,), jnp.float32, -bound, bound),
        "gamma": jnp.ones((out_c,), jnp.float32),    # BatchNorm2d default init
        "beta": jnp.zeros((out_c,), jnp.float32),
    }


def init_bottleneck_params(key, in_c):
    out_c = in_c // 4
    keys = jax.random.split(key, 5)
    return {
        "conv1x1_1": init_conv_params(keys[0], in_c, out_c, 1),
        "conv3x3_s1": init_conv_params(keys[1], out_c, out_c, 3),
        "conv1x1_2": init_conv_params(keys[2], out_c, in_c, 1),
        "download": init_conv_params(keys[3], out_c, out_c, 3),
        "download_conv": init_conv_params(keys[4], out_c, in_c, 1),
    }


def init_myblock_params(key, in_c):
    k1, k2 = jax.random.split(key)
    return {"block1": init_bottleneck_params(k1, in_c),
            "block2": init_bottleneck_params(k2, in_c)}


# ------------------------ plain-JAX reference ------------------------------ #

def _ref_conv_bn(x, p, *, s, pad, is_act):
    w_hwio = jnp.transpose(p["w"], (2, 3, 1, 0))
    y = lax.conv_general_dilated(
        x, w_hwio, window_strides=(s, s), padding=[(pad, pad), (pad, pad)],
        dimension_numbers=("NHWC", "HWIO", "NHWC"))
    y = y + p["b"]                                   # bias kept in the reference
    m = jnp.mean(y, axis=(0, 1, 2), keepdims=True)
    v = jnp.mean((y - m) ** 2, axis=(0, 1, 2), keepdims=True)
    y = (y - m) / jnp.sqrt(v + EPS) * p["gamma"] + p["beta"]
    return jnp.maximum(y, 0.0) if is_act else y


def _ref_bottleneck_resnet(x, params):
    x1 = _ref_conv_bn(x, params["conv1x1_1"], s=1, pad=0, is_act=True)
    x1 = _ref_conv_bn(x1, params["conv3x3_s1"], s=1, pad=1, is_act=True)
    x1 = x + _ref_conv_bn(x1, params["conv1x1_2"], s=1, pad=0, is_act=False)
    return jnp.maximum(x1, 0.0)


def _ref_bottleneck_down(x, params):
    x1 = _ref_conv_bn(x, params["conv1x1_1"], s=1, pad=0, is_act=True)
    x1 = _ref_conv_bn(x1, params["download"], s=2, pad=1, is_act=True)
    x1 = _ref_conv_bn(x1, params["download_conv"], s=1, pad=0, is_act=True)
    return x1


def _ref_myblock(x_nchw, params, *, repeat, is_first):
    x = jnp.transpose(x_nchw, (0, 2, 3, 1))
    if is_first:
        for _ in range(repeat):
            x = _ref_bottleneck_resnet(x, params["block1"])
    else:
        for i in range(repeat):
            x = _ref_bottleneck_down(x, params["block2"]) if i == 0 \
                else _ref_bottleneck_resnet(x, params["block1"])
    return jnp.transpose(x, (0, 3, 1, 2))


# --------------------------------- main ------------------------------------ #

if __name__ == "__main__":
    key = jax.random.PRNGKey(0)
    kx, kp = jax.random.split(key)

    # MyBlock(in_c=16, repeat=2, isFirst=False) on a (2, 16, 16, 16) NCHW input.
    N, C, H, W = 2, 16, 16, 16
    repeat, is_first = 2, False

    x = jax.random.normal(kx, (N, C, H, W), jnp.float32)
    params = init_myblock_params(kp, C)

    out = jax.block_until_ready(
        myblock_forward(x, params, repeat=repeat, is_first=is_first))

    # sanity check vs plain-JAX reference (training-mode BN; the reference keeps
    # the conv bias while the kernel folds it out — they must still match).
    ref = jax.block_until_ready(
        _ref_myblock(x, params, repeat=repeat, is_first=is_first))
    assert out.shape == (N, C, H // 2, W // 2), out.shape
    err = float(jnp.max(jnp.abs(out - ref)))
    assert jnp.allclose(out, ref, atol=2e-3, rtol=2e-3), err

    print("KERNEL_OK")
</pallas_src>

<mosaic_0001>
module attributes {stable_mosaic.version = 11 : i64} {
  func.func @kernel(%arg0: i32, %arg1: memref<16x512xf32, #tpu.memory_space<vmem>>, %arg2: memref<8x16xf32, #tpu.memory_space<vmem>>, %arg3: memref<8x1xf32, #tpu.memory_space<vmem>>, %arg4: memref<8x1xf32, #tpu.memory_space<vmem>>, %arg5: memref<8x72xf32, #tpu.memory_space<vmem>>, %arg6: memref<8x1xf32, #tpu.memory_space<vmem>>, %arg7: memref<8x1xf32, #tpu.memory_space<vmem>>, %arg8: memref<16x8xf32, #tpu.memory_space<vmem>>, %arg9: memref<16x1xf32, #tpu.memory_space<vmem>>, %arg10: memref<16x1xf32, #tpu.memory_space<vmem>>, %arg11: memref<8x16xf32, #tpu.memory_space<vmem>>, %arg12: memref<8x1xf32, #tpu.memory_space<vmem>>, %arg13: memref<8x1xf32, #tpu.memory_space<vmem>>, %arg14: memref<8x72xf32, #tpu.memory_space<vmem>>, %arg15: memref<8x1xf32, #tpu.memory_space<vmem>>, %arg16: memref<8x1xf32, #tpu.memory_space<vmem>>, %arg17: memref<16x8xf32, #tpu.memory_space<vmem>>, %arg18: memref<16x1xf32, #tpu.memory_space<vmem>>, %arg19: memref<16x1xf32, #tpu.memory_space<vmem>>, %arg20: memref<9x512xf32, #tpu.memory_space<vmem>>, %arg21: memref<512x1xi32, #tpu.memory_space<vmem>>, %arg22: memref<1x128xi32, #tpu.memory_space<vmem>>, %arg23: memref<9x128xf32, #tpu.memory_space<vmem>>, %arg24: memref<16x128xf32, #tpu.memory_space<vmem>>) attributes {dimension_semantics = [#tpu.dimension_semantics<arbitrary>], iteration_bounds = array<i64: 1>, scalar_prefetch = 0 : i64, scratch_operands = 0 : i64, tpu.core_type = #tpu.core_type<tc>, window_params = [{pipeline_mode = #tpu.pipeline_mode<synchronous>, transform_indices = @transform_0, window_bounds = array<i64: 16, 512>}, {pipeline_mode = #tpu.pipeline_mode<synchronous>, transform_indices = @transform_1, window_bounds = array<i64: 8, 16>}, {pipeline_mode = #tpu.pipeline_mode<synchronous>, transform_indices = @transform_2, window_bounds = array<i64: 8, 1>}, {pipeline_mode = #tpu.pipeline_mode<synchronous>, transform_indices = @transform_3, window_bounds = array<i64: 8, 1>}, {pipeline_mode = #tpu.pipeline_mode<synchronous>, transform_indices = @transform_4, window_bounds = array<i64: 8, 72>}, {pipeline_mode = #tpu.pipeline_mode<synchronous>, transform_indices = @transform_5, window_bounds = array<i64: 8, 1>}, {pipeline_mode = #tpu.pipeline_mode<synchronous>, transform_indices = @transform_6, window_bounds = array<i64: 8, 1>}, {pipeline_mode = #tpu.pipeline_mode<synchronous>, transform_indices = @transform_7, window_bounds = array<i64: 16, 8>}, {pipeline_mode = #tpu.pipeline_mode<synchronous>, transform_indices = @transform_8, window_bounds = array<i64: 16, 1>}, {pipeline_mode = #tpu.pipeline_mode<synchronous>, transform_indices = @transform_9, window_bounds = array<i64: 16, 1>}, {pipeline_mode = #tpu.pipeline_mode<synchronous>, transform_indices = @transform_10, window_bounds = array<i64: 8, 16>}, {pipeline_mode = #tpu.pipeline_mode<synchronous>, transform_indices = @transform_11, window_bounds = array<i64: 8, 1>}, {pipeline_mode = #tpu.pipeline_mode<synchronous>, transform_indices = @transform_12, window_bounds = array<i64: 8, 1>}, {pipeline_mode = #tpu.pipeline_mode<synchronous>, transform_indices = @transform_13, window_bounds = array<i64: 8, 72>}, {pipeline_mode = #tpu.pipeline_mode<synchronous>, transform_indices = @transform_14, window_bounds = array<i64: 8, 1>}, {pipeline_mode = #tpu.pipeline_mode<synchronous>, transform_indices = @transform_15, window_bounds = array<i64: 8, 1>}, {pipeline_mode = #tpu.pipeline_mode<synchronous>, transform_indices = @transform_16, window_bounds = array<i64: 16, 8>}, {pipeline_mode = #tpu.pipeline_mode<synchronous>, transform_indices = @transform_17, window_bounds = array<i64: 16, 1>}, {pipeline_mode = #tpu.pipeline_mode<synchronous>, transform_indices = @transform_18, window_bounds = array<i64: 16, 1>}, {pipeline_mode = #tpu.pipeline_mode<synchronous>, transform_indices = @transform_19, window_bounds = array<i64: 9, 512>}, {pipeline_mode = #tpu.pipeline_mode<synchronous>, transform_indices = @transform_20, window_bounds = array<i64: 512, 1>}, {pipeline_mode = #tpu.pipeline_mode<synchronous>, transform_indices = @transform_21, window_bounds = array<i64: 1, 128>}, {pipeline_mode = #tpu.pipeline_mode<synchronous>, transform_indices = @transform_22, window_bounds = array<i64: 9, 128>}, {pipeline_mode = #tpu.pipeline_mode<synchronous>, transform_indices = @transform_23, window_bounds = array<i64: 16, 128>}]} {
    %c0 = arith.constant 0 : index
    %c0_0 = arith.constant 0 : index
    %0 = vector.load %arg20[%c0, %c0_0] : memref<9x512xf32, #tpu.memory_space<vmem>>, vector<9x512xf32>
    %c0_1 = arith.constant 0 : index
    %c0_2 = arith.constant 0 : index
    %1 = vector.load %arg23[%c0_1, %c0_2] : memref<9x128xf32, #tpu.memory_space<vmem>>, vector<9x128xf32>
    %c0_3 = arith.constant 0 : index
    %c0_4 = arith.constant 0 : index
    %2 = vector.load %arg1[%c0_3, %c0_4] : memref<16x512xf32, #tpu.memory_space<vmem>>, vector<16x512xf32>
    %c0_5 = arith.constant 0 : index
    %c0_6 = arith.constant 0 : index
    %3 = vector.load %arg11[%c0_5, %c0_6] : memref<8x16xf32, #tpu.memory_space<vmem>>, vector<8x16xf32>
    %cst = arith.constant dense<0.000000e+00> : vector<8x512xf32>
    %4 = tpu.matmul %3, %2, %cst {dimension_numbers = #tpu.dot_dimension_numbers<[1], [0], [0], [1], [0, 0, 1, 1], [], []>} : vector<8x16xf32>, vector<16x512xf32>, vector<8x512xf32> -> vector<8x512xf32>
    %cst_7 = arith.constant dense<0.000000e+00> : vector<8xf32>
    %5 = vector.multi_reduction <add>, %4, %cst_7 [1] : vector<8x512xf32> to vector<8xf32>
    %6 = vector.shape_cast %5 : vector<8xf32> to vector<8x1xf32>
    %cst_8 = arith.constant 5.120000e+02 : f32
    %7 = vector.broadcast %cst_8 : f32 to vector<8x1xf32>
    %8 = arith.divf %6, %7 : vector<8x1xf32>
    %9 = arith.mulf %4, %4 : vector<8x512xf32>
    %cst_9 = arith.constant dense<0.000000e+00> : vector<8xf32>
    %10 = vector.multi_reduction <add>, %9, %cst_9 [1] : vector<8x512xf32> to vector<8xf32>
    %11 = vector.shape_cast %10 : vector<8xf32> to vector<8x1xf32>
    %cst_10 = arith.constant 5.120000e+02 : f32
    %12 = vector.broadcast %cst_10 : f32 to vector<8x1xf32>
    %13 = arith.divf %11, %12 : vector<8x1xf32>
    %14 = arith.mulf %8, %8 : vector<8x1xf32>
    %15 = arith.subf %13, %14 : vector<8x1xf32>
    %16 = vector.broadcast %8 : vector<8x1xf32> to vector<8x512xf32>
    %17 = arith.subf %4, %16 : vector<8x512xf32>
    %cst_11 = arith.constant 9.99999974E-6 : f32
    %18 = vector.broadcast %cst_11 : f32 to vector<8x1xf32>
    %19 = arith.addf %15, %18 : vector<8x1xf32>
    %20 = math.rsqrt %19 : vector<8x1xf32>
    %21 = vector.broadcast %20 : vector<8x1xf32> to vector<8x512xf32>
    %22 = arith.mulf %17, %21 : vector<8x512xf32>
    %c0_12 = arith.constant 0 : index
    %c0_13 = arith.constant 0 : index
    %23 = vector.load %arg12[%c0_12, %c0_13] : memref<8x1xf32, #tpu.memory_space<vmem>>, vector<8x1xf32>
    %24 = vector.broadcast %23 : vector<8x1xf32> to vector<8x512xf32>
    %25 = arith.mulf %22, %24 : vector<8x512xf32>
    %c0_14 = arith.constant 0 : index
    %c0_15 = arith.constant 0 : index
    %26 = vector.load %arg13[%c0_14, %c0_15] : memref<8x1xf32, #tpu.memory_space<vmem>>, vector<8x1xf32>
    %27 = vector.broadcast %26 : vector<8x1xf32> to vector<8x512xf32>
    %28 = arith.addf %25, %27 : vector<8x512xf32>
    %cst_16 = arith.constant 0.000000e+00 : f32
    %29 = vector.broadcast %cst_16 : f32 to vector<8x512xf32>
    %30 = arith.maximumf %28, %29 : vector<8x512xf32>
    %c17_i32 = arith.constant 17 : i32
    %31 = tpu.dynamic_rotate %30 by %c17_i32 dim 1 : vector<8x512xf32>, i32 -> vector<8x512xf32>
    %32 = vector.extract_strided_slice %0 {offsets = [0, 0], sizes = [1, 512], strides = [1, 1]} : vector<9x512xf32> to vector<1x512xf32>
    %33 = vector.broadcast %32 : vector<1x512xf32> to vector<8x512xf32>
    %34 = arith.mulf %31, %33 : vector<8x512xf32>
    %c16_i32 = arith.constant 16 : i32
    %35 = tpu.dynamic_rotate %30 by %c16_i32 dim 1 : vector<8x512xf32>, i32 -> vector<8x512xf32>
    %36 = vector.extract_strided_slice %0 {offsets = [1, 0], sizes = [1, 512], strides = [1, 1]} : vector<9x512xf32> to vector<1x512xf32>
    %37 = vector.broadcast %36 : vector<1x512xf32> to vector<8x512xf32>
    %38 = arith.mulf %35, %37 : vector<8x512xf32>
    %c15_i32 = arith.constant 15 : i32
    %39 = tpu.dynamic_rotate %30 by %c15_i32 dim 1 : vector<8x512xf32>, i32 -> vector<8x512xf32>
    %40 = vector.extract_strided_slice %0 {offsets = [2, 0], sizes = [1, 512], strides = [1, 1]} : vector<9x512xf32> to vector<1x512xf32>
    %41 = vector.broadcast %40 : vector<1x512xf32> to vector<8x512xf32>
    %42 = arith.mulf %39, %41 : vector<8x512xf32>
    %c1_i32 = arith.constant 1 : i32
    %43 = tpu.dynamic_rotate %30 by %c1_i32 dim 1 : vector<8x512xf32>, i32 -> vector<8x512xf32>
    %44 = vector.extract_strided_slice %0 {offsets = [3, 0], sizes = [1, 512], strides = [1, 1]} : vector<9x512xf32> to vector<1x512xf32>
    %45 = vector.broadcast %44 : vector<1x512xf32> to vector<8x512xf32>
    %46 = arith.mulf %43, %45 : vector<8x512xf32>
    %c511_i32 = arith.constant 511 : i32
    %47 = tpu.dynamic_rotate %30 by %c511_i32 dim 1 : vector<8x512xf32>, i32 -> vector<8x512xf32>
    %48 = vector.extract_strided_slice %0 {offsets = [5, 0], sizes = [1, 512], strides = [1, 1]} : vector<9x512xf32> to vector<1x512xf32>
    %49 = vector.broadcast %48 : vector<1x512xf32> to vector<8x512xf32>
    %50 = arith.mulf %47, %49 : vector<8x512xf32>
    %c497_i32 = arith.constant 497 : i32
    %51 = tpu.dynamic_rotate %30 by %c497_i32 dim 1 : vector<8x512xf32>, i32 -> vector<8x512xf32>
    %52 = vector.extract_strided_slice %0 {offsets = [6, 0], sizes = [1, 512], strides = [1, 1]} : vector<9x512xf32> to vector<1x512xf32>
    %53 = vector.broadcast %52 : vector<1x512xf32> to vector<8x512xf32>
    %54 = arith.mulf %51, %53 : vector<8x512xf32>
    %c496_i32 = arith.constant 496 : i32
    %55 = tpu.dynamic_rotate %30 by %c496_i32 dim 1 : vector<8x512xf32>, i32 -> vector<8x512xf32>
    %56 = vector.extract_strided_slice %0 {offsets = [7, 0], sizes = [1, 512], strides = [1, 1]} : vector<9x512xf32> to vector<1x512xf32>
    %57 = vector.broadcast %56 : vector<1x512xf32> to vector<8x512xf32>
    %58 = arith.mulf %55, %57 : vector<8x512xf32>
    %c495_i32 = arith.constant 495 : i32
    %59 = tpu.dynamic_rotate %30 by %c495_i32 dim 1 : vector<8x512xf32>, i32 -> vector<8x512xf32>
    %60 = vector.extract_strided_slice %0 {offsets = [8, 0], sizes = [1, 512], strides = [1, 1]} : vector<9x512xf32> to vector<1x512xf32>
    %61 = vector.broadcast %60 : vector<1x512xf32> to vector<8x512xf32>
    %62 = arith.mulf %59, %61 : vector<8x512xf32>
    %63 = tpu.concatenate %34, %38, %42, %46, %30, %50, %54, %58, %62 in 0 : vector<8x512xf32>, vector<8x512xf32>, vector<8x512xf32>, vector<8x512xf32>, vector<8x512xf32>, vector<8x512xf32>, vector<8x512xf32>, vector<8x512xf32>, vector<8x512xf32> -> vector<72x512xf32>
    %c0_17 = arith.constant 0 : index
    %c0_18 = arith.constant 0 : index
    %64 = vector.load %arg14[%c0_17, %c0_18] : memref<8x72xf32, #tpu.memory_space<vmem>>, vector<8x72xf32>
    %cst_19 = arith.constant dense<0.000000e+00> : vector<8x512xf32>
    %65 = tpu.matmul %64, %63, %cst_19 {dimension_numbers = #tpu.dot_dimension_numbers<[1], [0], [0], [1], [0, 0, 1, 1], [], []>} : vector<8x72xf32>, vector<72x512xf32>, vector<8x512xf32> -> vector<8x512xf32>
    %c0_20 = arith.constant 0 : index
    %c0_21 = arith.constant 0 : index
    %66 = vector.load %arg21[%c0_20, %c0_21] : memref<512x1xi32, #tpu.memory_space<vmem>>, vector<512x1xi32>
    %c0_22 = arith.constant 0 : index
    %c0_23 = arith.constant 0 : index
    %67 = vector.load %arg22[%c0_22, %c0_23] : memref<1x128xi32, #tpu.memory_space<vmem>>, vector<1x128xi32>
    %68 = vector.broadcast %66 : vector<512x1xi32> to vector<512x128xi32>
    %69 = vector.broadcast %67 : vector<1x128xi32> to vector<512x128xi32>
    %70 = arith.cmpi eq, %68, %69 : vector<512x128xi32>
    %71 = arith.extui %70 : vector<512x128xi1> to vector<512x128xi32>
    %72 = arith.sitofp %71 : vector<512x128xi32> to vector<512x128xf32>
    %cst_24 = arith.constant dense<0.000000e+00> : vector<8x128xf32>
    %73 = tpu.matmul %65, %72, %cst_24 {dimension_numbers = #tpu.dot_dimension_numbers<[1], [0], [0], [1], [0, 0, 1, 1], [], []>} : vector<8x512xf32>, vector<512x128xf32>, vector<8x128xf32> -> vector<8x128xf32>
    %cst_25 = arith.constant dense<0.000000e+00> : vector<8xf32>
    %74 = vector.multi_reduction <add>, %73, %cst_25 [1] : vector<8x128xf32> to vector<8xf32>
    %75 = vector.shape_cast %74 : vector<8xf32> to vector<8x1xf32>
    %cst_26 = arith.constant 1.280000e+02 : f32
    %76 = vector.broadcast %cst_26 : f32 to vector<8x1xf32>
    %77 = arith.divf %75, %76 : vector<8x1xf32>
    %78 = arith.mulf %73, %73 : vector<8x128xf32>
    %cst_27 = arith.constant dense<0.000000e+00> : vector<8xf32>
    %79 = vector.multi_reduction <add>, %78, %cst_27 [1] : vector<8x128xf32> to vector<8xf32>
    %80 = vector.shape_cast %79 : vector<8xf32> to vector<8x1xf32>
    %cst_28 = arith.constant 1.280000e+02 : f32
    %81 = vector.broadcast %cst_28 : f32 to vector<8x1xf32>
    %82 = arith.divf %80, %81 : vector<8x1xf32>
    %83 = arith.mulf %77, %77 : vector<8x1xf32>
    %84 = arith.subf %82, %83 : vector<8x1xf32>
    %85 = vector.broadcast %77 : vector<8x1xf32> to vector<8x128xf32>
    %86 = arith.subf %73, %85 : vector<8x128xf32>
    %cst_29 = arith.constant 9.99999974E-6 : f32
    %87 = vector.broadcast %cst_29 : f32 to vector<8x1xf32>
    %88 = arith.addf %84, %87 : vector<8x1xf32>
    %89 = math.rsqrt %88 : vector<8x1xf32>
    %90 = vector.broadcast %89 : vector<8x1xf32> to vector<8x128xf32>
    %91 = arith.mulf %86, %90 : vector<8x128xf32>
    %c0_30 = arith.constant 0 : index
    %c0_31 = arith.constant 0 : index
    %92 = vector.load %arg15[%c0_30, %c0_31] : memref<8x1xf32, #tpu.memory_space<vmem>>, vector<8x1xf32>
    %93 = vector.broadcast %92 : vector<8x1xf32> to vector<8x128xf32>
    %94 = arith.mulf %91, %93 : vector<8x128xf32>
    %c0_32 = arith.constant 0 : index
    %c0_33 = arith.constant 0 : index
    %95 = vector.load %arg16[%c0_32, %c0_33] : memref<8x1xf32, #tpu.memory_space<vmem>>, vector<8x1xf32>
    %96 = vector.broadcast %95 : vector<8x1xf32> to vector<8x128xf32>
    %97 = arith.addf %94, %96 : vector<8x128xf32>
    %cst_34 = arith.constant 0.000000e+00 : f32
    %98 = vector.broadcast %cst_34 : f32 to vector<8x128xf32>
    %99 = arith.maximumf %97, %98 : vector<8x128xf32>
    %c0_35 = arith.constant 0 : index
    %c0_36 = arith.constant 0 : index
    %100 = vector.load %arg17[%c0_35, %c0_36] : memref<16x8xf32, #tpu.memory_space<vmem>>, vector<16x8xf32>
    %cst_37 = arith.constant dense<0.000000e+00> : vector<16x128xf32>
    %101 = tpu.matmul %100, %99, %cst_37 {dimension_numbers = #tpu.dot_dimension_numbers<[1], [0], [0], [1], [0, 0, 1, 1], [], []>} : vector<16x8xf32>, vector<8x128xf32>, vector<16x128xf32> -> vector<16x128xf32>
    %cst_38 = arith.constant dense<0.000000e+00> : vector<16xf32>
    %102 = vector.multi_reduction <add>, %101, %cst_38 [1] : vector<16x128xf32> to vector<16xf32>
    %103 = vector.shape_cast %102 : vector<16xf32> to vector<16x1xf32>
    %cst_39 = arith.constant 1.280000e+02 : f32
    %104 = vector.broadcast %cst_39 : f32 to vector<16x1xf32>
    %105 = arith.divf %103, %104 : vector<16x1xf32>
    %106 = arith.mulf %101, %101 : vector<16x128xf32>
    %cst_40 = arith.constant dense<0.000000e+00> : vector<16xf32>
    %107 = vector.multi_reduction <add>, %106, %cst_40 [1] : vector<16x128xf32> to vector<16xf32>
    %108 = vector.shape_cast %107 : vector<16xf32> to vector<16x1xf32>
    %cst_41 = arith.constant 1.280000e+02 : f32
    %109 = vector.broadcast %cst_41 : f32 to vector<16x1xf32>
    %110 = arith.divf %108, %109 : vector<16x1xf32>
    %111 = arith.mulf %105, %105 : vector<16x1xf32>
    %112 = arith.subf %110, %111 : vector<16x1xf32>
    %113 = vector.broadcast %105 : vector<16x1xf32> to vector<16x128xf32>
    %114 = arith.subf %101, %113 : vector<16x128xf32>
    %cst_42 = arith.constant 9.99999974E-6 : f32
    %115 = vector.broadcast %cst_42 : f32 to vector<16x1xf32>
    %116 = arith.addf %112, %115 : vector<16x1xf32>
    %117 = math.rsqrt %116 : vector<16x1xf32>
    %118 = vector.broadcast %117 : vector<16x1xf32> to vector<16x128xf32>
    %119 = arith.mulf %114, %118 : vector<16x128xf32>
    %c0_43 = arith.constant 0 : index
    %c0_44 = arith.constant 0 : index
    %120 = vector.load %arg18[%c0_43, %c0_44] : memref<16x1xf32, #tpu.memory_space<vmem>>, vector<16x1xf32>
    %121 = vector.broadcast %120 : vector<16x1xf32> to vector<16x128xf32>
    %122 = arith.mulf %119, %121 : vector<16x128xf32>
    %c0_45 = arith.constant 0 : index
    %c0_46 = arith.constant 0 : index
    %123 = vector.load %arg19[%c0_45, %c0_46] : memref<16x1xf32, #tpu.memory_space<vmem>>, vector<16x1xf32>
    %124 = vector.broadcast %123 : vector<16x1xf32> to vector<16x128xf32>
    %125 = arith.addf %122, %124 : vector<16x128xf32>
    %cst_47 = arith.constant 0.000000e+00 : f32
    %126 = vector.broadcast %cst_47 : f32 to vector<16x128xf32>
    %127 = arith.maximumf %125, %126 : vector<16x128xf32>
    %c0_48 = arith.constant 0 : index
    %c0_49 = arith.constant 0 : index
    %128 = vector.load %arg2[%c0_48, %c0_49] : memref<8x16xf32, #tpu.memory_space<vmem>>, vector<8x16xf32>
    %cst_50 = arith.constant dense<0.000000e+00> : vector<8x128xf32>
    %129 = tpu.matmul %128, %127, %cst_50 {dimension_numbers = #tpu.dot_dimension_numbers<[1], [0], [0], [1], [0, 0, 1, 1], [], []>} : vector<8x16xf32>, vector<16x128xf32>, vector<8x128xf32> -> vector<8x128xf32>
    %cst_51 = arith.constant dense<0.000000e+00> : vector<8xf32>
    %130 = vector.multi_reduction <add>, %129, %cst_51 [1] : vector<8x128xf32> to vector<8xf32>
    %131 = vector.shape_cast %130 : vector<8xf32> to vector<8x1xf32>
    %cst_52 = arith.constant 1.280000e+02 : f32
    %132 = vector.broadcast %cst_52 : f32 to vector<8x1xf32>
    %133 = arith.divf %131, %132 : vector<8x1xf32>
    %134 = arith.mulf %129, %129 : vector<8x128xf32>
    %cst_53 = arith.constant dense<0.000000e+00> : vector<8xf32>
    %135 = vector.multi_reduction <add>, %134, %cst_53 [1] : vector<8x128xf32> to vector<8xf32>
    %136 = vector.shape_cast %135 : vector<8xf32> to vector<8x1xf32>
    %cst_54 = arith.constant 1.280000e+02 : f32
    %137 = vector.broadcast %cst_54 : f32 to vector<8x1xf32>
    %138 = arith.divf %136, %137 : vector<8x1xf32>
    %139 = arith.mulf %133, %133 : vector<8x1xf32>
    %140 = arith.subf %138, %139 : vector<8x1xf32>
    %141 = vector.broadcast %133 : vector<8x1xf32> to vector<8x128xf32>
    %142 = arith.subf %129, %141 : vector<8x128xf32>
    %cst_55 = arith.constant 9.99999974E-6 : f32
    %143 = vector.broadcast %cst_55 : f32 to vector<8x1xf32>
    %144 = arith.addf %140, %143 : vector<8x1xf32>
    %145 = math.rsqrt %144 : vector<8x1xf32>
    %146 = vector.broadcast %145 : vector<8x1xf32> to vector<8x128xf32>
    %147 = arith.mulf %142, %146 : vector<8x128xf32>
    %c0_56 = arith.constant 0 : index
    %c0_57 = arith.constant 0 : index
    %148 = vector.load %arg3[%c0_56, %c0_57] : memref<8x1xf32, #tpu.memory_space<vmem>>, vector<8x1xf32>
    %149 = vector.broadcast %148 : vector<8x1xf32> to vector<8x128xf32>
    %150 = arith.mulf %147, %149 : vector<8x128xf32>
    %c0_58 = arith.constant 0 : index
    %c0_59 = arith.constant 0 : index
    %151 = vector.load %arg4[%c0_58, %c0_59] : memref<8x1xf32, #tpu.memory_space<vmem>>, vector<8x1xf32>
    %152 = vector.broadcast %151 : vector<8x1xf32> to vector<8x128xf32>
    %153 = arith.addf %150, %152 : vector<8x128xf32>
    %cst_60 = arith.constant 0.000000e+00 : f32
    %154 = vector.broadcast %cst_60 : f32 to vector<8x128xf32>
    %155 = arith.maximumf %153, %154 : vector<8x128xf32>
    %c9_i32 = arith.constant 9 : i32
    %156 = tpu.dynamic_rotate %155 by %c9_i32 dim 1 : vector<8x128xf32>, i32 -> vector<8x128xf32>
    %157 = vector.extract_strided_slice %1 {offsets = [0, 0], sizes = [1, 128], strides = [1, 1]} : vector<9x128xf32> to vector<1x128xf32>
    %158 = vector.broadcast %157 : vector<1x128xf32> to vector<8x128xf32>
    %159 = arith.mulf %156, %158 : vector<8x128xf32>
    %c8_i32 = arith.constant 8 : i32
    %160 = tpu.dynamic_rotate %155 by %c8_i32 dim 1 : vector<8x128xf32>, i32 -> vector<8x128xf32>
    %161 = vector.extract_strided_slice %1 {offsets = [1, 0], sizes = [1, 128], strides = [1, 1]} : vector<9x128xf32> to vector<1x128xf32>
    %162 = vector.broadcast %161 : vector<1x128xf32> to vector<8x128xf32>
    %163 = arith.mulf %160, %162 : vector<8x128xf32>
    %c7_i32 = arith.constant 7 : i32
    %164 = tpu.dynamic_rotate %155 by %c7_i32 dim 1 : vector<8x128xf32>, i32 -> vector<8x128xf32>
    %165 = vector.extract_strided_slice %1 {offsets = [2, 0], sizes = [1, 128], strides = [1, 1]} : vector<9x128xf32> to vector<1x128xf32>
    %166 = vector.broadcast %165 : vector<1x128xf32> to vector<8x128xf32>
    %167 = arith.mulf %164, %166 : vector<8x128xf32>
    %c1_i32_61 = arith.constant 1 : i32
    %168 = tpu.dynamic_rotate %155 by %c1_i32_61 dim 1 : vector<8x128xf32>, i32 -> vector<8x128xf32>
    %169 = vector.extract_strided_slice %1 {offsets = [3, 0], sizes = [1, 128], strides = [1, 1]} : vector<9x128xf32> to vector<1x128xf32>
    %170 = vector.broadcast %169 : vector<1x128xf32> to vector<8x128xf32>
    %171 = arith.mulf %168, %170 : vector<8x128xf32>
    %c127_i32 = arith.constant 127 : i32
    %172 = tpu.dynamic_rotate %155 by %c127_i32 dim 1 : vector<8x128xf32>, i32 -> vector<8x128xf32>
    %173 = vector.extract_strided_slice %1 {offsets = [5, 0], sizes = [1, 128], strides = [1, 1]} : vector<9x128xf32> to vector<1x128xf32>
    %174 = vector.broadcast %173 : vector<1x128xf32> to vector<8x128xf32>
    %175 = arith.mulf %172, %174 : vector<8x128xf32>
    %c121_i32 = arith.constant 121 : i32
    %176 = tpu.dynamic_rotate %155 by %c121_i32 dim 1 : vector<8x128xf32>, i32 -> vector<8x128xf32>
    %177 = vector.extract_strided_slice %1 {offsets = [6, 0], sizes = [1, 128], strides = [1, 1]} : vector<9x128xf32> to vector<1x128xf32>
    %178 = vector.broadcast %177 : vector<1x128xf32> to vector<8x128xf32>
    %179 = arith.mulf %176, %178 : vector<8x128xf32>
    %c120_i32 = arith.constant 120 : i32
    %180 = tpu.dynamic_rotate %155 by %c120_i32 dim 1 : vector<8x128xf32>, i32 -> vector<8x128xf32>
    %181 = vector.extract_strided_slice %1 {offsets = [7, 0], sizes = [1, 128], strides = [1, 1]} : vector<9x128xf32> to vector<1x128xf32>
    %182 = vector.broadcast %181 : vector<1x128xf32> to vector<8x128xf32>
    %183 = arith.mulf %180, %182 : vector<8x128xf32>
    %c119_i32 = arith.constant 119 : i32
    %184 = tpu.dynamic_rotate %155 by %c119_i32 dim 1 : vector<8x128xf32>, i32 -> vector<8x128xf32>
    %185 = vector.extract_strided_slice %1 {offsets = [8, 0], sizes = [1, 128], strides = [1, 1]} : vector<9x128xf32> to vector<1x128xf32>
    %186 = vector.broadcast %185 : vector<1x128xf32> to vector<8x128xf32>
    %187 = arith.mulf %184, %186 : vector<8x128xf32>
    %188 = tpu.concatenate %159, %163, %167, %171, %155, %175, %179, %183, %187 in 0 : vector<8x128xf32>, vector<8x128xf32>, vector<8x128xf32>, vector<8x128xf32>, vector<8x128xf32>, vector<8x128xf32>, vector<8x128xf32>, vector<8x128xf32>, vector<8x128xf32> -> vector<72x128xf32>
    %c0_62 = arith.constant 0 : index
    %c0_63 = arith.constant 0 : index
    %189 = vector.load %arg5[%c0_62, %c0_63] : memref<8x72xf32, #tpu.memory_space<vmem>>, vector<8x72xf32>
    %cst_64 = arith.constant dense<0.000000e+00> : vector<8x128xf32>
    %190 = tpu.matmul %189, %188, %cst_64 {dimension_numbers = #tpu.dot_dimension_numbers<[1], [0], [0], [1], [0, 0, 1, 1], [], []>} : vector<8x72xf32>, vector<72x128xf32>, vector<8x128xf32> -> vector<8x128xf32>
    %cst_65 = arith.constant dense<0.000000e+00> : vector<8xf32>
    %191 = vector.multi_reduction <add>, %190, %cst_65 [1] : vector<8x128xf32> to vector<8xf32>
    %192 = vector.shape_cast %191 : vector<8xf32> to vector<8x1xf32>
    %cst_66 = arith.constant 1.280000e+02 : f32
    %193 = vector.broadcast %cst_66 : f32 to vector<8x1xf32>
    %194 = arith.divf %192, %193 : vector<8x1xf32>
    %195 = arith.mulf %190, %190 : vector<8x128xf32>
    %cst_67 = arith.constant dense<0.000000e+00> : vector<8xf32>
    %196 = vector.multi_reduction <add>, %195, %cst_67 [1] : vector<8x128xf32> to vector<8xf32>
    %197 = vector.shape_cast %196 : vector<8xf32> to vector<8x1xf32>
    %cst_68 = arith.constant 1.280000e+02 : f32
    %198 = vector.broadcast %cst_68 : f32 to vector<8x1xf32>
    %199 = arith.divf %197, %198 : vector<8x1xf32>
    %200 = arith.mulf %194, %194 : vector<8x1xf32>
    %201 = arith.subf %199, %200 : vector<8x1xf32>
    %202 = vector.broadcast %194 : vector<8x1xf32> to vector<8x128xf32>
    %203 = arith.subf %190, %202 : vector<8x128xf32>
    %cst_69 = arith.constant 9.99999974E-6 : f32
    %204 = vector.broadcast %cst_69 : f32 to vector<8x1xf32>
    %205 = arith.addf %201, %204 : vector<8x1xf32>
    %206 = math.rsqrt %205 : vector<8x1xf32>
    %207 = vector.broadcast %206 : vector<8x1xf32> to vector<8x128xf32>
    %208 = arith.mulf %203, %207 : vector<8x128xf32>
    %c0_70 = arith.constant 0 : index
    %c0_71 = arith.constant 0 : index
    %209 = vector.load %arg6[%c0_70, %c0_71] : memref<8x1xf32, #tpu.memory_space<vmem>>, vector<8x1xf32>
    %210 = vector.broadcast %209 : vector<8x1xf32> to vector<8x128xf32>
    %211 = arith.mulf %208, %210 : vector<8x128xf32>
    %c0_72 = arith.constant 0 : index
    %c0_73 = arith.constant 0 : index
    %212 = vector.load %arg7[%c0_72, %c0_73] : memref<8x1xf32, #tpu.memory_space<vmem>>, vector<8x1xf32>
    %213 = vector.broadcast %212 : vector<8x1xf32> to vector<8x128xf32>
    %214 = arith.addf %211, %213 : vector<8x128xf32>
    %cst_74 = arith.constant 0.000000e+00 : f32
    %215 = vector.broadcast %cst_74 : f32 to vector<8x128xf32>
    %216 = arith.maximumf %214, %215 : vector<8x128xf32>
    %c0_75 = arith.constant 0 : index
    %c0_76 = arith.constant 0 : index
    %217 = vector.load %arg8[%c0_75, %c0_76] : memref<16x8xf32, #tpu.memory_space<vmem>>, vector<16x8xf32>
    %cst_77 = arith.constant dense<0.000000e+00> : vector<16x128xf32>
    %218 = tpu.matmul %217, %216, %cst_77 {dimension_numbers = #tpu.dot_dimension_numbers<[1], [0], [0], [1], [0, 0, 1, 1], [], []>} : vector<16x8xf32>, vector<8x128xf32>, vector<16x128xf32> -> vector<16x128xf32>
    %cst_78 = arith.constant dense<0.000000e+00> : vector<16xf32>
    %219 = vector.multi_reduction <add>, %218, %cst_78 [1] : vector<16x128xf32> to vector<16xf32>
    %220 = vector.shape_cast %219 : vector<16xf32> to vector<16x1xf32>
    %cst_79 = arith.constant 1.280000e+02 : f32
    %221 = vector.broadcast %cst_79 : f32 to vector<16x1xf32>
    %222 = arith.divf %220, %221 : vector<16x1xf32>
    %223 = arith.mulf %218, %218 : vector<16x128xf32>
    %cst_80 = arith.constant dense<0.000000e+00> : vector<16xf32>
    %224 = vector.multi_reduction <add>, %223, %cst_80 [1] : vector<16x128xf32> to vector<16xf32>
    %225 = vector.shape_cast %224 : vector<16xf32> to vector<16x1xf32>
    %cst_81 = arith.constant 1.280000e+02 : f32
    %226 = vector.broadcast %cst_81 : f32 to vector<16x1xf32>
    %227 = arith.divf %225, %226 : vector<16x1xf32>
    %228 = arith.mulf %222, %222 : vector<16x1xf32>
    %229 = arith.subf %227, %228 : vector<16x1xf32>
    %230 = vector.broadcast %222 : vector<16x1xf32> to vector<16x128xf32>
    %231 = arith.subf %218, %230 : vector<16x128xf32>
    %cst_82 = arith.constant 9.99999974E-6 : f32
    %232 = vector.broadcast %cst_82 : f32 to vector<16x1xf32>
    %233 = arith.addf %229, %232 : vector<16x1xf32>
    %234 = math.rsqrt %233 : vector<16x1xf32>
    %235 = vector.broadcast %234 : vector<16x1xf32> to vector<16x128xf32>
    %236 = arith.mulf %231, %235 : vector<16x128xf32>
    %c0_83 = arith.constant 0 : index
    %c0_84 = arith.constant 0 : index
    %237 = vector.load %arg9[%c0_83, %c0_84] : memref<16x1xf32, #tpu.memory_space<vmem>>, vector<16x1xf32>
    %238 = vector.broadcast %237 : vector<16x1xf32> to vector<16x128xf32>
    %239 = arith.mulf %236, %238 : vector<16x128xf32>
    %c0_85 = arith.constant 0 : index
    %c0_86 = arith.constant 0 : index
    %240 = vector.load %arg10[%c0_85, %c0_86] : memref<16x1xf32, #tpu.memory_space<vmem>>, vector<16x1xf32>
    %241 = vector.broadcast %240 : vector<16x1xf32> to vector<16x128xf32>
    %242 = arith.addf %239, %241 : vector<16x128xf32>
    %243 = arith.addf %242, %127 : vector<16x128xf32>
    %cst_87 = arith.constant 0.000000e+00 : f32
    %244 = vector.broadcast %cst_87 : f32 to vector<16x128xf32>
    %245 = arith.maximumf %243, %244 : vector<16x128xf32>
    %c0_88 = arith.constant 0 : index
    %c0_89 = arith.constant 0 : index
    %246 = vector.load %arg24[%c0_88, %c0_89] : memref<16x128xf32, #tpu.memory_space<vmem>>, vector<16x128xf32>
    tpu.vector_store %arg24[%c0_88, %c0_89], %245 {strides = array<i32>} : memref<16x128xf32, #tpu.memory_space<vmem>>, vector<16x128xf32>,
    return
  }
  func.func @transform_0(%arg0: i32) -> (i32, i32) {
    %c0_i32 = arith.constant 0 : i32
    %c0_i32_0 = arith.constant 0 : i32
    %c0_i32_1 = arith.constant 0 : i32
    return %c0_i32, %c0_i32_0 : i32, i32
  }
  func.func @transform_1(%arg0: i32) -> (i32, i32) {
    %c0_i32 = arith.constant 0 : i32
    %c0_i32_0 = arith.constant 0 : i32
    %c0_i32_1 = arith.constant 0 : i32
    return %c0_i32, %c0_i32_0 : i32, i32
  }
  func.func @transform_2(%arg0: i32) -> (i32, i32) {
    %c0_i32 = arith.constant 0 : i32
    %c0_i32_0 = arith.constant 0 : i32
    %c0_i32_1 = arith.constant 0 : i32
    return %c0_i32, %c0_i32_0 : i32, i32
  }
  func.func @transform_3(%arg0: i32) -> (i32, i32) {
    %c0_i32 = arith.constant 0 : i32
    %c0_i32_0 = arith.constant 0 : i32
    %c0_i32_1 = arith.constant 0 : i32
    return %c0_i32, %c0_i32_0 : i32, i32
  }
  func.func @transform_4(%arg0: i32) -> (i32, i32) {
    %c0_i32 = arith.constant 0 : i32
    %c0_i32_0 = arith.constant 0 : i32
    %c0_i32_1 = arith.constant 0 : i32
    return %c0_i32, %c0_i32_0 : i32, i32
  }
  func.func @transform_5(%arg0: i32) -> (i32, i32) {
    %c0_i32 = arith.constant 0 : i32
    %c0_i32_0 = arith.constant 0 : i32
    %c0_i32_1 = arith.constant 0 : i32
    return %c0_i32, %c0_i32_0 : i32, i32
  }
  func.func @transform_6(%arg0: i32) -> (i32, i32) {
    %c0_i32 = arith.constant 0 : i32
    %c0_i32_0 = arith.constant 0 : i32
    %c0_i32_1 = arith.constant 0 : i32
    return %c0_i32, %c0_i32_0 : i32, i32
  }
  func.func @transform_7(%arg0: i32) -> (i32, i32) {
    %c0_i32 = arith.constant 0 : i32
    %c0_i32_0 = arith.constant 0 : i32
    %c0_i32_1 = arith.constant 0 : i32
    return %c0_i32, %c0_i32_0 : i32, i32
  }
  func.func @transform_8(%arg0: i32) -> (i32, i32) {
    %c0_i32 = arith.constant 0 : i32
    %c0_i32_0 = arith.constant 0 : i32
    %c0_i32_1 = arith.constant 0 : i32
    return %c0_i32, %c0_i32_0 : i32, i32
  }
  func.func @transform_9(%arg0: i32) -> (i32, i32) {
    %c0_i32 = arith.constant 0 : i32
    %c0_i32_0 = arith.constant 0 : i32
    %c0_i32_1 = arith.constant 0 : i32
    return %c0_i32, %c0_i32_0 : i32, i32
  }
  func.func @transform_10(%arg0: i32) -> (i32, i32) {
    %c0_i32 = arith.constant 0 : i32
    %c0_i32_0 = arith.constant 0 : i32
    %c0_i32_1 = arith.constant 0 : i32
    return %c0_i32, %c0_i32_0 : i32, i32
  }
  func.func @transform_11(%arg0: i32) -> (i32, i32) {
    %c0_i32 = arith.constant 0 : i32
    %c0_i32_0 = arith.constant 0 : i32
    %c0_i32_1 = arith.constant 0 : i32
    return %c0_i32, %c0_i32_0 : i32, i32
  }
  func.func @transform_12(%arg0: i32) -> (i32, i32) {
    %c0_i32 = arith.constant 0 : i32
    %c0_i32_0 = arith.constant 0 : i32
    %c0_i32_1 = arith.constant 0 : i32
    return %c0_i32, %c0_i32_0 : i32, i32
  }
  func.func @transform_13(%arg0: i32) -> (i32, i32) {
    %c0_i32 = arith.constant 0 : i32
    %c0_i32_0 = arith.constant 0 : i32
    %c0_i32_1 = arith.constant 0 : i32
    return %c0_i32, %c0_i32_0 : i32, i32
  }
  func.func @transform_14(%arg0: i32) -> (i32, i32) {
    %c0_i32 = arith.constant 0 : i32
    %c0_i32_0 = arith.constant 0 : i32
    %c0_i32_1 = arith.constant 0 : i32
    return %c0_i32, %c0_i32_0 : i32, i32
  }
  func.func @transform_15(%arg0: i32) -> (i32, i32) {
    %c0_i32 = arith.constant 0 : i32
    %c0_i32_0 = arith.constant 0 : i32
    %c0_i32_1 = arith.constant 0 : i32
    return %c0_i32, %c0_i32_0 : i32, i32
  }
  func.func @transform_16(%arg0: i32) -> (i32, i32) {
    %c0_i32 = arith.constant 0 : i32
    %c0_i32_0 = arith.constant 0 : i32
    %c0_i32_1 = arith.constant 0 : i32
    return %c0_i32, %c0_i32_0 : i32, i32
  }
  func.func @transform_17(%arg0: i32) -> (i32, i32) {
    %c0_i32 = arith.constant 0 : i32
    %c0_i32_0 = arith.constant 0 : i32
    %c0_i32_1 = arith.constant 0 : i32
    return %c0_i32, %c0_i32_0 : i32, i32
  }
  func.func @transform_18(%arg0: i32) -> (i32, i32) {
    %c0_i32 = arith.constant 0 : i32
    %c0_i32_0 = arith.constant 0 : i32
    %c0_i32_1 = arith.constant 0 : i32
    return %c0_i32, %c0_i32_0 : i32, i32
  }
  func.func @transform_19(%arg0: i32) -> (i32, i32) {
    %c0_i32 = arith.constant 0 : i32
    %c0_i32_0 = arith.constant 0 : i32
    %c0_i32_1 = arith.constant 0 : i32
    return %c0_i32, %c0_i32_0 : i32, i32
  }
  func.func @transform_20(%arg0: i32) -> (i32, i32) {
    %c0_i32 = arith.constant 0 : i32
    %c0_i32_0 = arith.constant 0 : i32
    %c0_i32_1 = arith.constant 0 : i32
    return %c0_i32, %c0_i32_0 : i32, i32
  }
  func.func @transform_21(%arg0: i32) -> (i32, i32) {
    %c0_i32 = arith.constant 0 : i32
    %c0_i32_0 = arith.constant 0 : i32
    %c0_i32_1 = arith.constant 0 : i32
    return %c0_i32, %c0_i32_0 : i32, i32
  }
  func.func @transform_22(%arg0: i32) -> (i32, i32) {
    %c0_i32 = arith.constant 0 : i32
    %c0_i32_0 = arith.constant 0 : i32
    %c0_i32_1 = arith.constant 0 : i32
    return %c0_i32, %c0_i32_0 : i32, i32
  }
  func.func @transform_23(%arg0: i32) -> (i32, i32) {
    %c0_i32 = arith.constant 0 : i32
    %c0_i32_0 = arith.constant 0 : i32
    %c0_i32_1 = arith.constant 0 : i32
    return %c0_i32, %c0_i32_0 : i32, i32
  }
}

</mosaic_0001>

<bundles_post_ra>
// kernel: myblock_forward.1
= control target key start
LH: loop header
LB: loop body
LE: loop exit
PB: predicated region body
PF: predicated region fallthrough
CT: control target
= control target key end

     0   :  { %v2181_v3 = vmov 0.0   ;;  %vm93_vm0 = vcmask 130048   ;;  %v2182_v10 = vmov 0   ;;  %s2184_s29 = smov 112   ;;  %s2188_s30 = smov 15   ;;  %vm559_vm9 = vcmask 588800   ;;  %s3067_s0 = inlined_call_operand.vmem [shape: f32[16,512], index: 0, kind: input, shape index: {}]   ;;  %s3068_s10 = inlined_call_operand.vmem [shape: f32[8,16], index: 10, kind: input, shape index: {}]   ;;  %s3069_s11 = inlined_call_operand.vmem [shape: f32[8,1], index: 11, kind: input, shape index: {}]   ;;  %s3070_s12 = inlined_call_operand.vmem [shape: f32[8,1], index: 12, kind: input, shape index: {}]   ;;  %s3071_s20 = inlined_call_operand.vmem [shape: s32[512,1], index: 20, kind: input, shape index: {}]   ;;  %s3072_s19 = inlined_call_operand.vmem [shape: f32[9,512], index: 19, kind: input, shape index: {}]   ;;  %s3073_s13 = inlined_call_operand.vmem [shape: f32[8,72], index: 13, kind: input, shape index: {}]   ;;  %s3074_s21 = inlined_call_operand.vmem [shape: s32[1,128], index: 21, kind: input, shape index: {}]   ;;  %s3075_s15 = inlined_call_operand.vmem [shape: f32[8,1], index: 15, kind: input, shape index: {}]   ;;  %s3076_s14 = inlined_call_operand.vmem [shape: f32[8,1], index: 14, kind: input, shape index: {}]   ;;  %s3077_s17 = inlined_call_operand.vmem [shape: f32[16,1], index: 17, kind: input, shape index: {}]   ;;  %s3078_s16 = inlined_call_operand.vmem [shape: f32[16,8], index: 16, kind: input, shape index: {}]   ;;  %s3079_s18 = inlined_call_operand.vmem [shape: f32[16,1], index: 18, kind: input, shape index: {}]   ;;  %s3080_s1 = inlined_call_operand.vmem [shape: f32[8,16], index: 1, kind: input, shape index: {}]   ;;  %s3081_s3 = inlined_call_operand.vmem [shape: f32[8,1], index: 3, kind: input, shape index: {}]   ;;  %s3082_s2 = inlined_call_operand.vmem [shape: f32[8,1], index: 2, kind: input, shape index: {}]   ;;  %s3083_s22 = inlined_call_operand.vmem [shape: f32[9,128], index: 22, kind: input, shape index: {}]   ;;  %s3084_s4 = inlined_call_operand.vmem [shape: f32[8,72], index: 4, kind: input, shape index: {}]   ;;  %s3085_s6 = inlined_call_operand.vmem [shape: f32[8,1], index: 6, kind: input, shape index: {}]   ;;  %s3086_s5 = inlined_call_operand.vmem [shape: f32[8,1], index: 5, kind: input, shape index: {}]   ;;  %s3087_s8 = inlined_call_operand.vmem [shape: f32[16,1], index: 8, kind: input, shape index: {}]   ;;  %s3088_s7 = inlined_call_operand.vmem [shape: f32[16,8], index: 7, kind: input, shape index: {}]   ;;  %s3089_s9 = inlined_call_operand.vmem [shape: f32[16,1], index: 9, kind: input, shape index: {}]   ;;  %s3090_s23 = inlined_call_operand.vmem [shape: f32[16,128], index: 23, kind: output, shape index: {}]  }
   0x1   :  { %3094 = sst [smem:[#allocation2_spill]] %s3067_s0  ;;  %161 = vmatprep.mubr.f32.mxu1 %v2181_v3  ;;  %627 = vmatprep.mubr.f32.mxu0 %v2181_v3  ;;  %s2186_s0 = smov 127  }
   0x2   :  { %3095 = sst [smem:[#allocation3_spill]] %s3068_s10  ;;  %2163 = vset.pattern.permute.xlu1 %v2182_v10  ;;  %2164 = vset.pattern.permute.xlu0 %v2182_v10  ;;  %s2189_s25 = smov 16  }
   0x3   :  { %3096 = sst [smem:[#allocation4_spill]] %s3069_s11  ;;  %s2197_s26 = smov 9  }
   0x4   :  { %3097 = sst [smem:[#allocation5_spill]] %s3070_s12  ;;  %s2185_s12 = smov 113  }
   0x5   :  { %3098 = sst [smem:[#allocation6_spill]] %s3071_s20  ;;  %s2187_s20 = smov 1  }
   0x6   :  { %3099 = sst [smem:[#allocation7_spill]] %s3072_s19  ;;  %s2190_s19 = smov 17  }
   0x7   :  { %3100 = sst [smem:[#allocation8_spill]] %s3073_s13 }
   0x8   :  { %3101 = sst [smem:[#allocation9_spill]] %s3074_s21 }
   0x9   :  { %s3102_s24 = sld [smem:[#allocation2_spill]] }
   0xa   :  { %s3103_s28 = sld [smem:[#allocation3_spill]] }
   0xb   :  { %s3104_s13 = sld [smem:[#allocation4_spill]] }
   0xc   :  { %s3106_s11 = sld [smem:[#allocation6_spill]] }
   0xd   :  { %s3107_s27 = sld [smem:[#allocation7_spill]] }
   0xe   :  { %s3109_s10 = sld [smem:[#allocation9_spill]] }
   0xf   :  { %v89_v0 = vld [vmem:[%s3102_s24 + $0x28] sm:$0xff]  ;;  %v88_v1 = vld [vmem:[%s3102_s24 + $0x20] sm:$0xff]  ;;  %v91_v6 = vld [vmem:[%s3102_s24 + $0x38] sm:$0xff] }
  0x10   :  { %v85_v2 = vld [vmem:[%s3102_s24 + $0x8] sm:$0xff]  ;;  %125 = vmatprep.subr.mxu1 %v89_v0  ;;  %v84_v4 = vld [vmem:[%s3102_s24] sm:$0xff]  ;;  %v90_v7 = vld [vmem:[%s3102_s24 + $0x30] sm:$0xff] }
  0x11   :  { %126 = vmatpush1.msra.mxu1 %v88_v1  ;;  %v92_v5 = vld [vmem:[%s3103_s28] sm:$0xff]  ;;  %v87_v8 = vld [vmem:[%s3102_s24 + $0x18] sm:$0xff]  ;;  %v86_v9 = vld [vmem:[%s3102_s24 + $0x10] sm:$0xff]  ;;  %s3105_s24 = sld [smem:[#allocation5_spill]]  ;;  %s2183_s28 = smov 111  }
  0x12   :  { %127 = vmatprep.subr.mxu1 %v85_v2  ;;  %v268_v11 = vld [vmem:[%s3104_s13] sm:$0xff]  ;;  %v768_v57 = vld [vmem:[%s3106_s11 + $0x1f8] sm:$0xff]  ;;  %v735_v58 = vld [vmem:[%s3106_s11 + $0xf0] sm:$0xff]  ;;  %s2198_s13 = smov 8  }
  0x13   :  { %128 = vmatpush1.msra.mxu1 %v84_v4  ;;  %271 = vperm.xlu1 %2163, %v268_v11   ;;  %v719_v59 = vld [vmem:[%s3106_s11 + $0x70] sm:$0xff]  ;;  %v734_v60 = vld [vmem:[%s3106_s11 + $0xe8] sm:$0xff]  ;;  %v736_v61 = vld [vmem:[%s3106_s11 + $0xf8] sm:$0xff] }
  0x14   :  { %1874 = vmatmul.mubr.msk.f32.vlgmr.msra.gmra.mxu1 %vm93_vm0, %v92_v5  ;;  %196 = vmatprep.subr.mxu1 %v91_v6  ;;  %v718_v62 = vld [vmem:[%s3106_s11 + $0x68] sm:$0xff]  ;;  %v720_v63 = vld [vmem:[%s3106_s11 + $0x78] sm:$0xff]  ;;  %v733_v0 = vld [vmem:[%s3106_s11 + $0xe0] sm:$0xff] }
  0x15   :  { %197 = vmatpush1.msra.mxu1 %v90_v7  ;;  %232 = vmatprep.mubr.f32.mxu1 %v2181_v3  ;;  %v752_v1 = vld [vmem:[%s3106_s11 + $0x178] sm:$0xff]  ;;  %v717_v2 = vld [vmem:[%s3106_s11 + $0x60] sm:$0xff]  ;;  %v767_v4 = vld [vmem:[%s3106_s11 + $0x1f0] sm:$0xff] }
  0x16   :  { %198 = vmatprep.subr.mxu1 %v87_v8  ;;  %v751_v6 = vld [vmem:[%s3106_s11 + $0x170] sm:$0xff]  ;;  %v716_v7 = vld [vmem:[%s3106_s11 + $0x58] sm:$0xff]  ;;  %v766_v8 = vld [vmem:[%s3106_s11 + $0x1e8] sm:$0xff] }
  0x17   :  { %199 = vmatpush1.msra.mxu1 %v86_v9  ;;  %v278_v12 = vld [vmem:[%s3105_s24] sm:$0xff]  ;;  %v731_v9 = vld [vmem:[%s3106_s11 + $0xd0] sm:$0xff]  ;;  %v750_v10 = vld [vmem:[%s3106_s11 + $0x168] sm:$0xff] }
  0x18   :  { %1875 = vmatmul.mubr.msk.f32.vlgmr.msra.gmra.mxu1 %vm93_vm0, %v92_v5  ;;  %281 = vperm.xlu1 %2163, %v278_v12   ;;  %v732_v5 = vld [vmem:[%s3106_s11 + $0xd8] sm:$0xff]  ;;  %v715_v11 = vld [vmem:[%s3106_s11 + $0x50] sm:$0xff]  ;;  %v765_v12 = vld [vmem:[%s3106_s11 + $0x1e0] sm:$0xff] }
  0x19   :  { %698 = vmatprep.mubr.f32.mxu1 %v2181_v3 }
  0x8e   :  { %v272_v34 = vpop.permute.xlu1 %271 }
  0x93   :  { %v282_v48 = vpop.permute.xlu1 %281 }
  0xd4   :  { %v163_v13 = vpop.f32.mrf.mxu1 }
  0xd5   :  { %v246_v15 = vmul.f32 %v163_v13, %v163_v13 }
  0xd6   :  { %v165_v14 = vpop.f32.mrf.mxu1 }
  0xd7   :  { %v239_v16 = vadd.f32 %v165_v14, %v163_v13  ;;  %v247_v17 = vmul.f32 %v165_v14, %v165_v14 }
  0xd8   :  { %v234_v18 = vpop.f32.mrf.mxu1 }
  0xd9   :  { %v248_v19 = vmul.f32 %v234_v18, %v234_v18  ;;  %v240_v20 = vadd.f32 %v239_v16, %v234_v18  ;;  %v250_v21 = vadd.f32 %v247_v17, %v246_v15  ;;  %v714_v15 = vld [vmem:[%s3106_s11 + $0x48] sm:$0xff]  ;;  %v764_v16 = vld [vmem:[%s3106_s11 + $0x1d8] sm:$0xff]  ;;  %v729_v17 = vld [vmem:[%s3106_s11 + $0xc0] sm:$0xff] }
  0xda   :  { %v236_v22 = vpop.f32.mrf.mxu1 }
  0xdb   :  { %v241_v23 = vadd.f32 %v240_v20, %v236_v22  ;;  %v249_v24 = vmul.f32 %v236_v22, %v236_v22  ;;  %v251_v25 = vadd.f32 %v250_v21, %v248_v19  ;;  %v748_v19 = vld [vmem:[%s3106_s11 + $0x158] sm:$0xff]  ;;  %v713_v20 = vld [vmem:[%s3106_s11 + $0x40] sm:$0xff] }
  0xdd   :  { %242 = vadd.xlane.f32.xlu0 %v241_v23  ;;  %v252_v26 = vadd.f32 %v251_v25, %v249_v24  ;;  %v728_v23 = vld [vmem:[%s3106_s11 + $0xb8] sm:$0xff] }
  0xe1   :  { %253 = vadd.xlane.f32.xlu0 %v252_v26 }
 0x166   :  { %v243_v27 = vpop.xlane.xlu0 %242 }
 0x167   :  { %v245_v28 = vmul.f32 0.001953125, %v243_v27  ;;  %v747_v27 = vld [vmem:[%s3106_s11 + $0x150] sm:$0xff] }
 0x169   :  { %v256_v30 = vmul.f32 %v245_v28, %v245_v28  ;;  %v258_v35 = vsub.f32 %v163_v13, %v245_v28  ;;  %v259_v36 = vsub.f32 %v165_v14, %v245_v28  ;;  %v260_v37 = vsub.f32 %v234_v18, %v245_v28  ;;  %v730_v13 = vld [vmem:[%s3106_s11 + $0xc8] sm:$0xff]  ;;  %v749_v14 = vld [vmem:[%s3106_s11 + $0x160] sm:$0xff] }
 0x16a   :  { %v254_v29 = vpop.xlane.xlu0 %253  ;;  %v261_v38 = vsub.f32 %v236_v22, %v245_v28  ;;  %v300_v18 = vlaneseq  ;;  %v763_v22 = vld [vmem:[%s3106_s11 + $0x1d0] sm:$0xff]  ;;  %v712_v28 = vld [vmem:[%s3106_s11 + $0x38] sm:$0xff] }
 0x16b   :  { %v255_v31 = vmul.f32 0.001953125, %v254_v29  ;;  %v1877_v29 = vld [vmem:[%s3107_s27 + $0x28] ss:$0 sm:$0xff] }
 0x16c   :  { %v2484_v21 = vand.u32 127, %v300_v18  ;;  %v2493_v26 = vshrl.u32 %v300_v18, 7 }
 0x16d   :  { %v257_v32 = vsub.f32 %v255_v31, %v256_v30 }
 0x16e   :  { %vm533_vm1 = vcmp.lt.s32.totalorder %v2484_v21, 111  ;;  %vm500_vm2 = vcmp.lt.s32.totalorder %v2484_v21, 112  ;;  %vm467_vm3 = vcmp.lt.s32.totalorder %v2484_v21, 113  ;;  %vm434_vm4 = vcmp.lt.s32.totalorder %v2484_v21, 127 }
 0x16f   :  { %v262_v33 = vadd.f32 1e-05, %v257_v32  ;;  %v1876_v32 = vld [vmem:[%s3107_s27 + $0x20] ss:$0 sm:$0xff]  ;;  %vm401_vm5 = vcmp.lt.s32.totalorder %v2484_v21, 1  ;;  %vm368_vm6 = vcmp.lt.s32.totalorder %v2484_v21, 15 }
 0x170   :  { %vm335_vm7 = vcmp.lt.s32.totalorder %v2484_v21, 16  ;;  %vm302_vm8 = vcmp.lt.s32.totalorder %v2484_v21, 17 }
 0x171   :  { %2165 = vrsqrt.f32 %v262_v33 }
 0x17e   :  { %v2166_v39 = vpop.eup %2165 }
 0x17f   :  { %v264_v40 = vmul.f32 %v2166_v39, %v258_v35  ;;  %v265_v41 = vmul.f32 %v2166_v39, %v259_v36  ;;  %v266_v42 = vmul.f32 %v2166_v39, %v260_v37  ;;  %v267_v43 = vmul.f32 %v2166_v39, %v261_v38  ;;  %v1878_v36 = vld [vmem:[%s3107_s27 + $0x30] ss:$0 sm:$0xff]  ;;  %v762_v37 = vld [vmem:[%s3106_s11 + $0x1c8] sm:$0xff] }
 0x180   :  { %v2518_v38 = vsub.s32 7, %v2493_v26 }
 0x181   :  { %v274_v44 = vmul.f32 %v272_v34, %v264_v40  ;;  %v275_v45 = vmul.f32 %v272_v34, %v265_v41  ;;  %v276_v46 = vmul.f32 %v272_v34, %v266_v42  ;;  %v277_v47 = vmul.f32 %v272_v34, %v267_v43  ;;  %v727_v40 = vld [vmem:[%s3106_s11 + $0xb0] sm:$0xff]  ;;  %v1879_v41 = vld [vmem:[%s3107_s27 + $0x38] ss:$0 sm:$0xff] }
 0x182   :  { %v2529_v42 = vld [vmem:[%s3107_s27 + $0x18] sm:$0xff] }
 0x183   :  { %v284_v49 = vadd.f32 %v282_v48, %v274_v44  ;;  %v285_v50 = vadd.f32 %v282_v48, %v275_v45  ;;  %v286_v51 = vadd.f32 %v282_v48, %v276_v46  ;;  %v287_v52 = vadd.f32 %v282_v48, %v277_v47 }
 0x185   :  { %v2358_v53 = vmax.f32 %v284_v49, 0.0  ;;  %v2360_v54 = vmax.f32 %v285_v50, 0.0  ;;  %v2364_v55 = vmax.f32 %v286_v51, 0.0  ;;  %v2366_v56 = vmax.f32 %v287_v52, 0.0  ;;  %v746_v50 = vld [vmem:[%s3106_s11 + $0x148] sm:$0xff]  ;;  %v711_v51 = vld [vmem:[%s3106_s11 + $0x30] sm:$0xff] }
 0x186   :  { %v520_v49 = vrot.slane %v2529_v42, %v2518_v38 }
 0x187   :  { %527 = vrot.lane.b32.xlu1 %v2360_v54, %s2183_s28  ;;  %525 = vrot.lane.b32.xlu0 %v2358_v53, %s2183_s28 }
 0x18b   :  { %529 = vrot.lane.b32.xlu1 %v2364_v55, %s2183_s28  ;;  %498 = vrot.lane.b32.xlu0 %v2366_v56, %s2184_s29 }
 0x18f   :  { %531 = vrot.lane.b32.xlu1 %v2366_v56, %s2183_s28  ;;  %461 = vrot.lane.b32.xlu0 %v2360_v54, %s2185_s12 }
 0x193   :  { %492 = vrot.lane.b32.xlu1 %v2358_v53, %s2184_s29  ;;  %465 = vrot.lane.b32.xlu0 %v2366_v56, %s2185_s12 }
 0x197   :  { %494 = vrot.lane.b32.xlu1 %v2360_v54, %s2184_s29  ;;  %428 = vrot.lane.b32.xlu0 %v2360_v54, %s2186_s0 }
 0x19b   :  { %496 = vrot.lane.b32.xlu1 %v2364_v55, %s2184_s29  ;;  %432 = vrot.lane.b32.xlu0 %v2366_v56, %s2186_s0 }
 0x19f   :  { %459 = vrot.lane.b32.xlu1 %v2358_v53, %s2185_s12  ;;  %395 = vrot.lane.b32.xlu0 %v2360_v54, %s2187_s20 }
 0x1a3   :  { %463 = vrot.lane.b32.xlu1 %v2364_v55, %s2185_s12  ;;  %399 = vrot.lane.b32.xlu0 %v2366_v56, %s2187_s20 }
 0x1a7   :  { %426 = vrot.lane.b32.xlu1 %v2358_v53, %s2186_s0  ;;  %362 = vrot.lane.b32.xlu0 %v2360_v54, %s2188_s30 }
 0x1ab   :  { %430 = vrot.lane.b32.xlu1 %v2364_v55, %s2186_s0  ;;  %366 = vrot.lane.b32.xlu0 %v2366_v56, %s2188_s30 }
 0x1af   :  { %393 = vrot.lane.b32.xlu1 %v2358_v53, %s2187_s20  ;;  %329 = vrot.lane.b32.xlu0 %v2360_v54, %s2189_s25 }
 0x1b3   :  { %397 = vrot.lane.b32.xlu1 %v2364_v55, %s2187_s20  ;;  %333 = vrot.lane.b32.xlu0 %v2366_v56, %s2189_s25 }
 0x1b7   :  { %360 = vrot.lane.b32.xlu1 %v2358_v53, %s2188_s30  ;;  %294 = vrot.lane.b32.xlu0 %v2360_v54, %s2190_s19 }
 0x1bb   :  { %364 = vrot.lane.b32.xlu1 %v2364_v55, %s2188_s30  ;;  %298 = vrot.lane.b32.xlu0 %v2366_v56, %s2190_s19  ;;  %s3108_s30 = sld [smem:[#allocation8_spill]] }
 0x1bf   :  { %327 = vrot.lane.b32.xlu1 %v2358_v53, %s2189_s25  ;;  %960 = vperm.xlu0 %2164, %v768_v57  }
 0x1c3   :  { %331 = vrot.lane.b32.xlu1 %v2364_v55, %s2189_s25  ;;  %861 = vperm.xlu0 %2164, %v735_v58  }
 0x1c7   :  { %292 = vrot.lane.b32.xlu1 %v2358_v53, %s2190_s19  ;;  %813 = vperm.xlu0 %2164, %v719_v59  }
 0x1cb   :  { %296 = vrot.lane.b32.xlu1 %v2364_v55, %s2190_s19  ;;  %858 = vperm.xlu0 %2164, %v734_v60   ;;  %v761_v60 = vld [vmem:[%s3106_s11 + $0x1c0] sm:$0xff] }
 0x1cf   :  { %864 = vperm.xlu1 %2163, %v736_v61   ;;  %810 = vperm.xlu0 %2164, %v718_v62   ;;  %v726_v61 = vld [vmem:[%s3106_s11 + $0xa8] sm:$0xff]  ;;  %v2557_v62 = vld [vmem:[%s3107_s27 + $0x10] sm:$0xff] }
 0x1d3   :  { %816 = vperm.xlu1 %2163, %v720_v63   ;;  %855 = vperm.xlu0 %2164, %v733_v0   ;;  %v2562_v63 = vld [vmem:[%s3107_s27 + $0x8] sm:$0xff] }
 0x1d7   :  { %912 = vperm.xlu1 %2163, %v752_v1   ;;  %807 = vperm.xlu0 %2164, %v717_v2   ;;  %v2569_v2 = vld [vmem:[%s3107_s27] sm:$0xff] }
 0x1db   :  { %957 = vperm.xlu1 %2163, %v767_v4   ;;  %852 = vperm.xlu0 %2164, %v732_v5   ;;  %v516_v4 = vrot.slane %v2557_v62, %v2518_v38  ;;  %v512_v5 = vrot.slane %v2562_v63, %v2518_v38 }
 0x1df   :  { %909 = vperm.xlu1 %2163, %v751_v6   ;;  %804 = vperm.xlu0 %2164, %v716_v7   ;;  %v2576_v6 = vsub.s32 6, %v2493_v26  ;;  %v745_v7 = vld [vmem:[%s3106_s11 + $0x140] sm:$0xff] }
 0x1e3   :  { %954 = vperm.xlu1 %2163, %v766_v8   ;;  %849 = vperm.xlu0 %2164, %v731_v9   ;;  %v710_v8 = vld [vmem:[%s3106_s11 + $0x28] sm:$0xff]  ;;  %v508_v9 = vrot.slane %v2569_v2, %v2518_v38 }
 0x1e7   :  { %906 = vperm.xlu1 %2163, %v750_v10   ;;  %801 = vperm.xlu0 %2164, %v715_v11  }
 0x1eb   :  { %951 = vperm.xlu1 %2163, %v765_v12   ;;  %846 = vperm.xlu0 %2164, %v730_v13  }
 0x1ef   :  { %903 = vperm.xlu1 %2163, %v749_v14   ;;  %798 = vperm.xlu0 %2164, %v714_v15  }
 0x1f3   :  { %948 = vperm.xlu1 %2163, %v764_v16   ;;  %843 = vperm.xlu0 %2164, %v729_v17   ;;  %v487_v17 = vrot.slane %v2529_v42, %v2576_v6 }
 0x1f7   :  { %900 = vperm.xlu1 %2163, %v748_v19   ;;  %795 = vperm.xlu0 %2164, %v713_v20   ;;  %v760_v19 = vld [vmem:[%s3106_s11 + $0x1b8] sm:$0xff]  ;;  %v725_v20 = vld [vmem:[%s3106_s11 + $0xa0] sm:$0xff] }
 0x1f9   :  { %v528_v24 = vpop.permute.xlu1 %527  ;;  %v526_v25 = vpop.permute.xlu0 %525 }
 0x1fa   :  { %v536_v33 = vsel %vm533_vm1, %v526_v25, %v528_v24 }
 0x1fb   :  { %945 = vperm.xlu1 %2163, %v763_v22   ;;  %840 = vperm.xlu0 %2164, %v728_v23   ;;  %v554_v39 = vmul.f32 %v1876_v32, %v536_v33  ;;  %v475_v32 = vrot.slane %v2569_v2, %v2576_v6 }
 0x1fd   :  { %v530_v30 = vpop.permute.xlu1 %529  ;;  %v499_v31 = vpop.permute.xlu0 %498 }
 0x1fe   :  { %v535_v34 = vsel %vm533_vm1, %v528_v24, %v530_v30 }
 0x1ff   :  { %897 = vperm.xlu1 %2163, %v747_v27   ;;  %792 = vperm.xlu0 %2164, %v712_v28   ;;  %v555_v35 = vmul.f32 %v1877_v29, %v535_v34  ;;  %v479_v28 = vrot.slane %v2562_v63, %v2576_v6  ;;  %v2610_v29 = vsub.s32 5, %v2493_v26 }
 0x201   :  { %577 = vmatprep.subr.mxu0 %v555_v35  ;;  %v532_v43 = vpop.permute.xlu1 %531  ;;  %v2531_v44 = vpop.permute.xlu0 %461 }
 0x202   :  { %v534_v45 = vsel %vm533_vm1, %v530_v30, %v532_v43  ;;  %v537_v46 = vsel %vm533_vm1, %v532_v43, %v526_v25  ;;  %578 = vmatpush1.msra.mxu0 %v554_v39  ;;  %v483_v25 = vrot.slane %v2557_v62, %v2576_v6  ;;  %v744_v30 = vld [vmem:[%s3106_s11 + $0x138] sm:$0xff] }
 0x203   :  { %v556_v47 = vmul.f32 %v1878_v36, %v534_v45  ;;  %942 = vperm.xlu1 %2163, %v762_v37   ;;  %837 = vperm.xlu0 %2164, %v727_v40   ;;  %v557_v48 = vmul.f32 %v1879_v41, %v537_v46  ;;  %v454_v41 = vrot.slane %v2529_v42, %v2610_v29  ;;  %v759_v45 = vld [vmem:[%s3106_s11 + $0x1b0] sm:$0xff]  ;;  %v724_v46 = vld [vmem:[%s3106_s11 + $0x98] sm:$0xff] }
 0x205   :  { %v493_v52 = vpop.permute.xlu1 %492  ;;  %648 = vmatprep.subr.mxu1 %v557_v48  ;;  %v466_v57 = vpop.permute.xlu0 %465 }
 0x206   :  { %v504_v58 = vsel %vm500_vm2, %v499_v31, %v493_v52  ;;  %649 = vmatpush1.msra.mxu1 %v556_v47 }
 0x207   :  { %894 = vperm.xlu1 %2163, %v746_v50   ;;  %789 = vperm.xlu0 %2164, %v711_v51   ;;  %v524_v59 = vmul.f32 %v520_v49, %v504_v58  ;;  %v2644_v49 = vsub.s32 3, %v2493_v26  ;;  %v450_v50 = vrot.slane %v2557_v62, %v2610_v29  ;;  %v708_v58 = vld [vmem:[%s3106_s11 + $0x18] sm:$0xff] }
 0x209   :  { %v495_v0 = vpop.permute.xlu1 %494  ;;  %650 = vmatprep.subr.mxu1 %v524_v59  ;;  %v2564_v1 = vpop.permute.xlu0 %428  ;;  %v442_v59 = vrot.slane %v2569_v2, %v2610_v29 }
 0x20a   :  { %v503_v10 = vsel %vm500_vm2, %v493_v52, %v495_v0  ;;  %v446_v52 = vrot.slane %v2562_v63, %v2610_v29 }
 0x20b   :  { %939 = vperm.xlu1 %2163, %v761_v60   ;;  %834 = vperm.xlu0 %2164, %v726_v61   ;;  %v521_v18 = vmul.f32 %v508_v9, %v503_v10  ;;  %v409_v10 = vrot.slane %v2569_v2, %v2644_v49 }
 0x20d   :  { %v497_v11 = vpop.permute.xlu1 %496  ;;  %v433_v12 = vpop.permute.xlu0 %432 }
 0x20e   :  { %v501_v13 = vsel %vm500_vm2, %v497_v11, %v499_v31  ;;  %v502_v14 = vsel %vm500_vm2, %v495_v0, %v497_v11  ;;  %v709_v31 = vld [vmem:[%s3106_s11 + $0x20] sm:$0xff] }
 0x20f   :  { %v523_v15 = vmul.f32 %v516_v4, %v501_v13  ;;  %891 = vperm.xlu1 %2163, %v745_v7   ;;  %786 = vperm.xlu0 %2164, %v710_v8   ;;  %v522_v16 = vmul.f32 %v512_v5, %v502_v14  ;;  %v413_v7 = vrot.slane %v2562_v63, %v2644_v49 }
 0x211   :  { %v460_v22 = vpop.permute.xlu1 %459  ;;  %579 = vmatprep.subr.mxu0 %v522_v16  ;;  %651 = vmatpush1.msra.mxu1 %v523_v15  ;;  %v2601_v23 = vpop.permute.xlu0 %395  ;;  %v417_v16 = vrot.slane %v2557_v62, %v2644_v49 }
 0x212   :  { %v471_v24 = vsel %vm467_vm3, %v466_v57, %v460_v22  ;;  %580 = vmatpush1.msra.mxu0 %v521_v18  ;;  %v470_v33 = vsel %vm467_vm3, %v460_v22, %v2531_v44 }
 0x213   :  { %936 = vperm.xlu1 %2163, %v760_v19   ;;  %831 = vperm.xlu0 %2164, %v725_v20   ;;  %v491_v27 = vmul.f32 %v487_v17, %v471_v24  ;;  %v488_v43 = vmul.f32 %v475_v32, %v470_v33  ;;  %v2689_v17 = vsub.s32 2, %v2493_v26  ;;  %v421_v20 = vrot.slane %v2529_v42, %v2644_v49 }
 0x215   :  { %v464_v34 = vpop.permute.xlu1 %463  ;;  %652 = vmatprep.subr.mxu1 %v491_v27  ;;  %v2623_v35 = vpop.permute.xlu0 %399 }
 0x216   :  { %v468_v36 = vsel %vm467_vm3, %v464_v34, %v466_v57  ;;  %v469_v37 = vsel %vm467_vm3, %v2531_v44, %v464_v34  ;;  %v743_v57 = vld [vmem:[%s3106_s11 + $0x130] sm:$0xff] }
 0x217   :  { %v490_v39 = vmul.f32 %v483_v25, %v468_v36  ;;  %888 = vperm.xlu1 %2163, %v744_v30   ;;  %783 = vperm.xlu0 %2164, %v709_v31   ;;  %v489_v40 = vmul.f32 %v479_v28, %v469_v37  ;;  %v707_v25 = vld [vmem:[%s3106_s11 + $0x10] sm:$0xff]  ;;  %v376_v30 = vrot.slane %v2569_v2, %v2689_v17  ;;  %v757_v31 = vld [vmem:[%s3106_s11 + $0x1a0] sm:$0xff] }
 0x218   :  { %v384_v36 = vrot.slane %v2557_v62, %v2689_v17 }
 0x219   :  { %v427_v47 = vpop.permute.xlu1 %426  ;;  %581 = vmatprep.subr.mxu0 %v489_v40  ;;  %653 = vmatpush1.msra.mxu1 %v490_v39  ;;  %v2639_v44 = vpop.permute.xlu0 %362  ;;  %v388_v40 = vrot.slane %v2529_v42, %v2689_v17 }
 0x21a   :  { %v438_v48 = vsel %vm434_vm4, %v433_v12, %v427_v47  ;;  %582 = vmatpush1.msra.mxu0 %v488_v43  ;;  %v437_v60 = vsel %vm434_vm4, %v427_v47, %v2564_v1  ;;  %v741_v43 = vld [vmem:[%s3106_s11 + $0x120] sm:$0xff] }
 0x21b   :  { %933 = vperm.xlu1 %2163, %v759_v45   ;;  %828 = vperm.xlu0 %2164, %v724_v46   ;;  %v458_v51 = vmul.f32 %v454_v41, %v438_v48  ;;  %v455_v11 = vmul.f32 %v442_v59, %v437_v60  ;;  %v2732_v41 = vsub.s32 1, %v2493_v26  ;;  %v706_v46 = vld [vmem:[%s3106_s11 + $0x8] sm:$0xff]  ;;  %v756_v59 = vld [vmem:[%s3106_s11 + $0x198] sm:$0xff] }
 0x21d   :  { %v431_v61 = vpop.permute.xlu1 %430  ;;  %654 = vmatprep.subr.mxu1 %v458_v51  ;;  %v2666_v5 = vpop.permute.xlu0 %366 }
 0x21e   :  { %v435_v0 = vsel %vm434_vm4, %v431_v61, %v433_v12  ;;  %v436_v4 = vsel %vm434_vm4, %v2564_v1, %v431_v61  ;;  %v758_v12 = vld [vmem:[%s3106_s11 + $0x1a8] sm:$0xff]  ;;  %v723_v1 = vld [vmem:[%s3106_s11 + $0x90] sm:$0xff] }
 0x21f   :  { %v457_v8 = vmul.f32 %v450_v50, %v435_v0  ;;  %885 = vperm.xlu1 %2163, %v743_v57   ;;  %780 = vperm.xlu0 %2164, %v708_v58   ;;  %v456_v9 = vmul.f32 %v446_v52, %v436_v4  ;;  %v347_v52 = vrot.slane %v2562_v63, %v2732_v41 }
 0x220   :  { %v343_v57 = vrot.slane %v2569_v2, %v2732_v41  ;;  %v351_v4 = vrot.slane %v2557_v62, %v2732_v41 }
 0x221   :  { %v394_v13 = vpop.permute.xlu1 %393  ;;  %583 = vmatprep.subr.mxu0 %v456_v9  ;;  %655 = vmatpush1.msra.mxu1 %v457_v8  ;;  %v2693_v22 = vpop.permute.xlu0 %329  ;;  %v355_v8 = vrot.slane %v2529_v42, %v2732_v41  ;;  %v2767_v9 = vsub.s32 0, %v2493_v26 }
 0x222   :  { %v404_v14 = vsel %vm401_vm5, %v394_v13, %v2601_v23  ;;  %v405_v15 = vsel %vm401_vm5, %v2623_v35, %v394_v13  ;;  %584 = vmatpush1.msra.mxu0 %v455_v11  ;;  %656 = vmatprep.subr.mxu1 %v2366_v56  ;;  %v742_v56 = vld [vmem:[%s3106_s11 + $0x128] sm:$0xff] }
 0x223   :  { %930 = vperm.xlu1 %2163, %v758_v12   ;;  %825 = vperm.xlu0 %2164, %v723_v1   ;;  %v423_v18 = vmul.f32 %v413_v7, %v404_v14  ;;  %v422_v19 = vmul.f32 %v409_v10, %v405_v15  ;;  %v740_v10 = vld [vmem:[%s3106_s11 + $0x118] sm:$0xff]  ;;  %v705_v12 = vld [vmem:[%s3106_s11] sm:$0xff] }
 0x224   :  { %585 = vmatprep.subr.mxu0 %v2360_v54  ;;  %657 = vmatpush1.msra.mxu1 %v2364_v55  ;;  %v380_v55 = vrot.slane %v2562_v63, %v2689_v17 }
 0x225   :  { %586 = vmatpush1.msra.mxu0 %v2358_v53  ;;  %v398_v24 = vpop.permute.xlu1 %397  ;;  %v334_v33 = vpop.permute.xlu0 %333 }
 0x226   :  { %v402_v27 = vsel %vm401_vm5, %v398_v24, %v2623_v35  ;;  %v403_v54 = vsel %vm401_vm5, %v2601_v23, %v398_v24  ;;  %587 = vmatprep.subr.mxu0 %v423_v18  ;;  %v722_v23 = vld [vmem:[%s3106_s11 + $0x88] sm:$0xff]  ;;  %v310_v18 = vrot.slane %v2569_v2, %v2767_v9 }
 0x227   :  { %v424_v28 = vmul.f32 %v417_v16, %v403_v54  ;;  %588 = vmatpush1.msra.mxu0 %v422_v19  ;;  %882 = vperm.xlu1 %2163, %v742_v56   ;;  %v425_v53 = vmul.f32 %v421_v20, %v402_v27  ;;  %v314_v16 = vrot.slane %v2562_v63, %v2767_v9  ;;  %v755_v19 = vld [vmem:[%s3106_s11 + $0x190] sm:$0xff] }
 0x228   :  { %777 = vperm.xlu0 %2164, %v707_v25   ;;  %v318_v63 = vrot.slane %v2557_v62, %v2767_v9  ;;  %v322_v27 = vrot.slane %v2529_v42, %v2767_v9  ;;  %v739_v54 = vld [vmem:[%s3106_s11 + $0x110] sm:$0xff] }
 0x229   :  { %v361_v32 = vpop.permute.xlu1 %360  ;;  %658 = vmatprep.subr.mxu1 %v425_v53  ;;  %v295_v58 = vpop.permute.xlu0 %294 }
 0x22a   :  { %v371_v34 = vsel %vm368_vm6, %v361_v32, %v2639_v44  ;;  %v372_v35 = vsel %vm368_vm6, %v2666_v5, %v361_v32  ;;  %659 = vmatpush1.msra.mxu1 %v424_v28  ;;  %v2810_v32 = vld [vmem:[%s3109_s10] ss:$0 sm:$0xff]  ;;  %s2196_s10 = smov 7  }
 0x22b   :  { %927 = vperm.xlu1 %2163, %v757_v31   ;;  %v390_v37 = vmul.f32 %v380_v55, %v371_v34  ;;  %v389_v39 = vmul.f32 %v376_v30, %v372_v35  ;;  %v558_v55 = vld [vmem:[%s3108_s30] sm:$0xff]  ;;  %v2191_v34 = vmov 1.0  }
 0x22c   :  { %822 = vperm.xlu0 %2164, %v722_v23   ;;  %v754_v23 = vld [vmem:[%s3106_s11 + $0x188] sm:$0xff] }
 0x22d   :  { %v365_v45 = vpop.permute.xlu1 %364  ;;  %589 = vmatprep.subr.mxu0 %v390_v37  ;;  %v299_v1 = vpop.permute.xlu0 %298 }
 0x22e   :  { %v369_v47 = vsel %vm368_vm6, %v365_v45, %v2666_v5  ;;  %v370_v48 = vsel %vm368_vm6, %v2639_v44, %v365_v45  ;;  %590 = vmatpush1.msra.mxu0 %v389_v39  ;;  %v721_v44 = vld [vmem:[%s3106_s11 + $0x80] sm:$0xff] }
 0x22f   :  { %v391_v50 = vmul.f32 %v384_v36, %v370_v48  ;;  %879 = vperm.xlu1 %2163, %v741_v43   ;;  %v392_v51 = vmul.f32 %v388_v40, %v369_v47  ;;  %v753_v36 = vld [vmem:[%s3106_s11 + $0x180] sm:$0xff] }
 0x230   :  { %774 = vperm.xlu0 %2164, %v706_v46   ;;  %v737_v40 = vld [vmem:[%s3106_s11 + $0x100] sm:$0xff] }
 0x231   :  { %v328_v60 = vpop.permute.xlu1 %327  ;;  %660 = vmatprep.subr.mxu1 %v392_v51 }
 0x232   :  { %v338_v61 = vsel %vm335_vm7, %v328_v60, %v2693_v22  ;;  %v339_v0 = vsel %vm335_vm7, %v334_v33, %v328_v60  ;;  %661 = vmatpush1.msra.mxu1 %v391_v50 }
 0x233   :  { %924 = vperm.xlu1 %2163, %v756_v59   ;;  %v357_v5 = vmul.f32 %v347_v52, %v338_v61  ;;  %v356_v7 = vmul.f32 %v343_v57, %v339_v0 }
 0x234   :  { %819 = vperm.xlu0 %2164, %v721_v44  }
 0x235   :  { %v332_v11 = vpop.permute.xlu1 %331  ;;  %591 = vmatprep.subr.mxu0 %v357_v5 }
 0x236   :  { %v336_v13 = vsel %vm335_vm7, %v332_v11, %v334_v33  ;;  %v337_v26 = vsel %vm335_vm7, %v2693_v22, %v332_v11  ;;  %592 = vmatpush1.msra.mxu0 %v356_v7  ;;  %v738_v33 = vld [vmem:[%s3106_s11 + $0x108] sm:$0xff] }
 0x237   :  { %v358_v14 = vmul.f32 %v351_v4, %v337_v26  ;;  %876 = vperm.xlu1 %2163, %v740_v10   ;;  %v359_v15 = vmul.f32 %v355_v8, %v336_v13 }
 0x238   :  { %771 = vperm.xlu0 %2164, %v705_v12  }
 0x239   :  { %v293_v20 = vpop.permute.xlu1 %292  ;;  %662 = vmatprep.subr.mxu1 %v359_v15 }
 0x23a   :  { %v305_v22 = vsel %vm302_vm8, %v293_v20, %v295_v58  ;;  %v306_v56 = vsel %vm302_vm8, %v299_v1, %v293_v20  ;;  %663 = vmatpush1.msra.mxu1 %v358_v14  ;;  %v961_v24 = vpop.permute.xlu0 %960 }
 0x23b   :  { %921 = vperm.xlu1 %2163, %v755_v19   ;;  %v324_v2 = vmul.f32 %v314_v16, %v305_v22  ;;  %v323_v25 = vmul.f32 %v310_v18, %v306_v56  ;;  %vm1029_vm10 = vcmp.eq.s32.totalorder %v961_v24, %v2810_v32 }
 0x23d   :  { %v297_v28 = vpop.permute.xlu1 %296  ;;  %593 = vmatprep.subr.mxu0 %v324_v2 }
 0x23e   :  { %v303_v53 = vsel %vm302_vm8, %v297_v28, %v299_v1  ;;  %v304_v62 = vsel %vm302_vm8, %v295_v58, %v297_v28  ;;  %594 = vmatpush1.msra.mxu0 %v323_v25  ;;  %v862_v30 = vpop.permute.xlu0 %861 }
 0x23f   :  { %v325_v42 = vmul.f32 %v318_v63, %v304_v62  ;;  %873 = vperm.xlu1 %2163, %v739_v54   ;;  %1880 = vmatmul.mubr.msk.f32.vlgmr.msra.gmra.mxu0 %vm559_vm9, %v558_v55  ;;  %v326_v31 = vmul.f32 %v322_v27, %v303_v53  ;;  %vm996_vm12 = vcmp.eq.s32.totalorder %v862_v30, %v2810_v32 }
 0x241   :  { %664 = vmatprep.subr.mxu1 %v326_v31 }
 0x242   :  { %665 = vmatpush1.msra.mxu1 %v325_v42  ;;  %v814_v21 = vpop.permute.xlu0 %813 }
 0x243   :  { %918 = vperm.xlu1 %2163, %v754_v23   ;;  %1881 = vmatmul.mubr.msk.f32.vlgmr.msra.gmra.mxu1 %vm559_vm9, %v558_v55  ;;  %vm980_vm13 = vcmp.eq.s32.totalorder %v814_v21, %v2810_v32 }
 0x244   :  { %2053 = vmatprep.subr.msk.mxu1 %vm1029_vm10, %v2191_v34 }
 0x246   :  { %v859_v35 = vpop.permute.xlu0 %858 }
 0x247   :  { %870 = vperm.xlu1 %2163, %v738_v33   ;;  %vm995_vm15 = vcmp.eq.s32.totalorder %v859_v35, %v2810_v32 }
 0x24a   :  { %v865_v37 = vpop.permute.xlu1 %864  ;;  %v811_v39 = vpop.permute.xlu0 %810 }
 0x24b   :  { %vm997_vm11 = vcmp.eq.s32.totalorder %v865_v37, %v2810_v32  ;;  %915 = vperm.xlu1 %2163, %v753_v36   ;;  %vm979_vm1 = vcmp.eq.s32.totalorder %v811_v39, %v2810_v32 }
 0x24c   :  { %2018 = vmatprep.subr.msk.mxu0 %vm997_vm11, %v2191_v34 }
 0x24e   :  { %v817_v43 = vpop.permute.xlu1 %816  ;;  %v856_v45 = vpop.permute.xlu0 %855 }
 0x24f   :  { %vm981_vm14 = vcmp.eq.s32.totalorder %v817_v43, %v2810_v32  ;;  %867 = vperm.xlu1 %2163, %v737_v40   ;;  %vm994_vm2 = vcmp.eq.s32.totalorder %v856_v45, %v2810_v32 }
 0x250   :  { %2019 = vmatpush3.msk.msra.mxu0 %vm981_vm14, %v2191_v34 }
 0x251   :  { %2020 = vmatprep.subr.msk.mxu0 %vm996_vm12, %v2191_v34 }
 0x252   :  { %v913_v46 = vpop.permute.xlu1 %912  ;;  %v808_v47 = vpop.permute.xlu0 %807  ;;  %2021 = vmatpush3.msk.msra.mxu0 %vm980_vm13, %v2191_v34 }
 0x253   :  { %vm1013_vm3 = vcmp.eq.s32.totalorder %v913_v46, %v2810_v32  ;;  %vm978_vm4 = vcmp.eq.s32.totalorder %v808_v47, %v2810_v32  ;;  %2022 = vmatprep.subr.msk.mxu0 %vm995_vm15, %v2191_v34 }
 0x254   :  { %2054 = vmatpush3.msk.msra.mxu1 %vm1013_vm3, %v2191_v34  ;;  %2023 = vmatpush3.msk.msra.mxu0 %vm979_vm1, %v2191_v34 }
 0x255   :  { %2024 = vmatprep.subr.msk.mxu0 %vm994_vm2, %v2191_v34 }
 0x256   :  { %v958_v48 = vpop.permute.xlu1 %957  ;;  %v853_v50 = vpop.permute.xlu0 %852  ;;  %2025 = vmatpush3.msk.msra.mxu0 %vm978_vm4, %v2191_v34 }
 0x257   :  { %vm1028_vm5 = vcmp.eq.s32.totalorder %v958_v48, %v2810_v32  ;;  %vm993_vm6 = vcmp.eq.s32.totalorder %v853_v50, %v2810_v32 }
 0x258   :  { %2055 = vmatprep.subr.msk.mxu1 %vm1028_vm5, %v2191_v34  ;;  %2026 = vmatprep.subr.msk.mxu0 %vm993_vm6, %v2191_v34 }
 0x25a   :  { %v910_v51 = vpop.permute.xlu1 %909  ;;  %v805_v52 = vpop.permute.xlu0 %804 }
 0x25b   :  { %vm1012_vm7 = vcmp.eq.s32.totalorder %v910_v51, %v2810_v32  ;;  %vm977_vm8 = vcmp.eq.s32.totalorder %v805_v52, %v2810_v32 }
 0x25c   :  { %2056 = vmatpush3.msk.msra.mxu1 %vm1012_vm7, %v2191_v34  ;;  %2027 = vmatpush3.msk.msra.mxu0 %vm977_vm8, %v2191_v34 }
 0x25e   :  { %v955_v57 = vpop.permute.xlu1 %954  ;;  %v850_v58 = vpop.permute.xlu0 %849 }
 0x25f   :  { %vm1027_vm10 = vcmp.eq.s32.totalorder %v955_v57, %v2810_v32  ;;  %vm992_vm11 = vcmp.eq.s32.totalorder %v850_v58, %v2810_v32 }
 0x260   :  { %2057 = vmatprep.subr.msk.mxu1 %vm1027_vm10, %v2191_v34  ;;  %2028 = vmatprep.subr.msk.mxu0 %vm992_vm11, %v2191_v34 }
 0x262   :  { %v907_v59 = vpop.permute.xlu1 %906  ;;  %v802_v60 = vpop.permute.xlu0 %801 }
 0x263   :  { %vm1011_vm12 = vcmp.eq.s32.totalorder %v907_v59, %v2810_v32  ;;  %vm976_vm13 = vcmp.eq.s32.totalorder %v802_v60, %v2810_v32 }
 0x264   :  { %2058 = vmatpush3.msk.msra.mxu1 %vm1011_vm12, %v2191_v34  ;;  %2029 = vmatpush3.msk.msra.mxu0 %vm976_vm13, %v2191_v34 }
 0x266   :  { %v952_v44 = vpop.permute.xlu1 %951  ;;  %v847_v61 = vpop.permute.xlu0 %846 }
 0x267   :  { %vm1026_vm14 = vcmp.eq.s32.totalorder %v952_v44, %v2810_v32  ;;  %vm991_vm15 = vcmp.eq.s32.totalorder %v847_v61, %v2810_v32 }
 0x268   :  { %2059 = vmatprep.subr.msk.mxu1 %vm1026_vm14, %v2191_v34  ;;  %2030 = vmatprep.subr.msk.mxu0 %vm991_vm15, %v2191_v34 }
 0x26a   :  { %v904_v0 = vpop.permute.xlu1 %903  ;;  %v799_v4 = vpop.permute.xlu0 %798 }
 0x26b   :  { %vm1010_vm1 = vcmp.eq.s32.totalorder %v904_v0, %v2810_v32  ;;  %vm975_vm2 = vcmp.eq.s32.totalorder %v799_v4, %v2810_v32 }
 0x26c   :  { %2060 = vmatpush3.msk.msra.mxu1 %vm1010_vm1, %v2191_v34  ;;  %2031 = vmatpush3.msk.msra.mxu0 %vm975_vm2, %v2191_v34 }
 0x26e   :  { %v949_v5 = vpop.permute.xlu1 %948  ;;  %v844_v7 = vpop.permute.xlu0 %843 }
 0x26f   :  { %vm1025_vm3 = vcmp.eq.s32.totalorder %v949_v5, %v2810_v32  ;;  %vm990_vm4 = vcmp.eq.s32.totalorder %v844_v7, %v2810_v32  ;;  %v1438_v5 = vld [vmem:[%s3077_s17 + $0x8] sm:$0xff]  ;;  %v1327_v7 = vld [vmem:[%s3078_s16] sm:$0xff] }
 0x270   :  { %2061 = vmatprep.subr.msk.mxu1 %vm1025_vm3, %v2191_v34  ;;  %2032 = vmatprep.subr.msk.mxu0 %vm990_vm4, %v2191_v34 }
 0x272   :  { %v901_v8 = vpop.permute.xlu1 %900  ;;  %v796_v10 = vpop.permute.xlu0 %795 }
 0x273   :  { %vm1009_vm5 = vcmp.eq.s32.totalorder %v901_v8, %v2810_v32  ;;  %vm974_vm6 = vcmp.eq.s32.totalorder %v796_v10, %v2810_v32 }
 0x274   :  { %2062 = vmatpush3.msk.msra.mxu1 %vm1009_vm5, %v2191_v34  ;;  %2033 = vmatpush3.msk.msra.mxu0 %vm974_vm6, %v2191_v34 }
 0x276   :  { %v946_v11 = vpop.permute.xlu1 %945  ;;  %v841_v12 = vpop.permute.xlu0 %840 }
 0x277   :  { %vm1024_vm7 = vcmp.eq.s32.totalorder %v946_v11, %v2810_v32  ;;  %vm989_vm8 = vcmp.eq.s32.totalorder %v841_v12, %v2810_v32 }
 0x278   :  { %2063 = vmatprep.subr.msk.mxu1 %vm1024_vm7, %v2191_v34  ;;  %2034 = vmatprep.subr.msk.mxu0 %vm989_vm8, %v2191_v34 }
 0x27a   :  { %v898_v1 = vpop.permute.xlu1 %897  ;;  %v793_v13 = vpop.permute.xlu0 %792 }
 0x27b   :  { %vm1008_vm10 = vcmp.eq.s32.totalorder %v898_v1, %v2810_v32  ;;  %vm973_vm11 = vcmp.eq.s32.totalorder %v793_v13, %v2810_v32 }
 0x27c   :  { %2064 = vmatpush3.msk.msra.mxu1 %vm1008_vm10, %v2191_v34  ;;  %2035 = vmatpush3.msk.msra.mxu0 %vm973_vm11, %v2191_v34 }
 0x27e   :  { %v943_v26 = vpop.permute.xlu1 %942  ;;  %v838_v14 = vpop.permute.xlu0 %837 }
 0x27f   :  { %vm1023_vm12 = vcmp.eq.s32.totalorder %v943_v26, %v2810_v32  ;;  %vm988_vm13 = vcmp.eq.s32.totalorder %v838_v14, %v2810_v32 }
 0x280   :  { %2065 = vmatprep.subr.msk.mxu1 %vm1023_vm12, %v2191_v34  ;;  %2036 = vmatprep.subr.msk.mxu0 %vm988_vm13, %v2191_v34 }
 0x282   :  { %v895_v15 = vpop.permute.xlu1 %894  ;;  %v790_v16 = vpop.permute.xlu0 %789 }
 0x283   :  { %vm1007_vm14 = vcmp.eq.s32.totalorder %v895_v15, %v2810_v32  ;;  %vm972_vm15 = vcmp.eq.s32.totalorder %v790_v16, %v2810_v32 }
 0x284   :  { %2066 = vmatpush3.msk.msra.mxu1 %vm1007_vm14, %v2191_v34  ;;  %2037 = vmatpush3.msk.msra.mxu0 %vm972_vm15, %v2191_v34 }
 0x286   :  { %v940_v18 = vpop.permute.xlu1 %939  ;;  %v835_v19 = vpop.permute.xlu0 %834 }
 0x287   :  { %vm1022_vm1 = vcmp.eq.s32.totalorder %v940_v18, %v2810_v32  ;;  %vm987_vm2 = vcmp.eq.s32.totalorder %v835_v19, %v2810_v32 }
 0x288   :  { %2067 = vmatprep.subr.msk.mxu1 %vm1022_vm1, %v2191_v34  ;;  %2038 = vmatprep.subr.msk.mxu0 %vm987_vm2, %v2191_v34 }
 0x28a   :  { %v892_v20 = vpop.permute.xlu1 %891  ;;  %v787_v22 = vpop.permute.xlu0 %786 }
 0x28b   :  { %vm1006_vm3 = vcmp.eq.s32.totalorder %v892_v20, %v2810_v32  ;;  %vm971_vm4 = vcmp.eq.s32.totalorder %v787_v22, %v2810_v32 }
 0x28c   :  { %2068 = vmatpush3.msk.msra.mxu1 %vm1006_vm3, %v2191_v34  ;;  %2039 = vmatpush3.msk.msra.mxu0 %vm971_vm4, %v2191_v34 }
 0x28e   :  { %v937_v56 = vpop.permute.xlu1 %936  ;;  %v832_v24 = vpop.permute.xlu0 %831 }
 0x28f   :  { %vm1021_vm5 = vcmp.eq.s32.totalorder %v937_v56, %v2810_v32  ;;  %vm986_vm6 = vcmp.eq.s32.totalorder %v832_v24, %v2810_v32  ;;  %v1328_v24 = vld [vmem:[%s3078_s16 + $0x8] sm:$0xff] }
 0x290   :  { %2040 = vmatprep.subr.msk.mxu0 %vm986_vm6, %v2191_v34  ;;  %2069 = vmatprep.subr.msk.mxu1 %vm1021_vm5, %v2191_v34 }
 0x292   :  { %v889_v63 = vpop.permute.xlu1 %888  ;;  %v784_v2 = vpop.permute.xlu0 %783 }
 0x293   :  { %vm1005_vm7 = vcmp.eq.s32.totalorder %v889_v63, %v2810_v32  ;;  %vm970_vm8 = vcmp.eq.s32.totalorder %v784_v2, %v2810_v32 }
 0x294   :  { %2041 = vmatpush3.msk.msra.mxu0 %vm970_vm8, %v2191_v34  ;;  %2070 = vmatpush3.msk.msra.mxu1 %vm1005_vm7, %v2191_v34 }
 0x296   :  { %v934_v25 = vpop.permute.xlu1 %933  ;;  %v829_v27 = vpop.permute.xlu0 %828 }
 0x297   :  { %vm1020_vm10 = vcmp.eq.s32.totalorder %v934_v25, %v2810_v32  ;;  %vm985_vm11 = vcmp.eq.s32.totalorder %v829_v27, %v2810_v32 }
 0x298   :  { %2042 = vmatprep.subr.msk.mxu0 %vm985_vm11, %v2191_v34  ;;  %2071 = vmatprep.subr.msk.mxu1 %vm1020_vm10, %v2191_v34 }
 0x29a   :  { %v886_v54 = vpop.permute.xlu1 %885  ;;  %v781_v55 = vpop.permute.xlu0 %780 }
 0x29b   :  { %vm1004_vm12 = vcmp.eq.s32.totalorder %v886_v54, %v2810_v32  ;;  %vm969_vm13 = vcmp.eq.s32.totalorder %v781_v55, %v2810_v32  ;;  %v1452_v54 = vld [vmem:[%s3079_s18 + $0x8] sm:$0xff]  ;;  %v1451_v55 = vld [vmem:[%s3079_s18] sm:$0xff] }
 0x29c   :  { %2043 = vmatpush3.msk.msra.mxu0 %vm969_vm13, %v2191_v34  ;;  %2072 = vmatpush3.msk.msra.mxu1 %vm1004_vm12, %v2191_v34 }
 0x29e   :  { %v931_v28 = vpop.permute.xlu1 %930  ;;  %v826_v53 = vpop.permute.xlu0 %825 }
 0x29f   :  { %vm1019_vm14 = vcmp.eq.s32.totalorder %v931_v28, %v2810_v32  ;;  %vm984_vm15 = vcmp.eq.s32.totalorder %v826_v53, %v2810_v32  ;;  %v1437_v28 = vld [vmem:[%s3077_s17] sm:$0xff] }
 0x2a0   :  { %2044 = vmatprep.subr.msk.mxu0 %vm984_vm15, %v2191_v34  ;;  %2073 = vmatprep.subr.msk.mxu1 %vm1019_vm14, %v2191_v34 }
 0x2a2   :  { %v883_v62 = vpop.permute.xlu1 %882 }
 0x2a3   :  { %vm1003_vm1 = vcmp.eq.s32.totalorder %v883_v62, %v2810_v32  ;;  %v778_v30 = vpop.permute.xlu0 %777 }
 0x2a4   :  { %vm968_vm2 = vcmp.eq.s32.totalorder %v778_v30, %v2810_v32  ;;  %2074 = vmatpush3.msk.msra.mxu1 %vm1003_vm1, %v2191_v34 }
 0x2a5   :  { %2045 = vmatpush3.msk.msra.mxu0 %vm968_vm2, %v2191_v34 }
 0x2a6   :  { %v928_v42 = vpop.permute.xlu1 %927 }
 0x2a7   :  { %vm1018_vm3 = vcmp.eq.s32.totalorder %v928_v42, %v2810_v32  ;;  %v823_v31 = vpop.permute.xlu0 %822 }
 0x2a8   :  { %vm983_vm4 = vcmp.eq.s32.totalorder %v823_v31, %v2810_v32  ;;  %2075 = vmatprep.subr.msk.mxu1 %vm1018_vm3, %v2191_v34  ;;  %vm1329_vm3 = vcmask 64512  }
 0x2a9   :  { %2046 = vmatprep.subr.msk.mxu0 %vm983_vm4, %v2191_v34  ;;  %vm2192_vm4 = vmmov 0  }
 0x2aa   :  { %v880_v23 = vpop.permute.xlu1 %879 }
 0x2ab   :  { %vm1002_vm5 = vcmp.eq.s32.totalorder %v880_v23, %v2810_v32  ;;  %v775_v21 = vpop.permute.xlu0 %774 }
 0x2ac   :  { %vm967_vm6 = vcmp.eq.s32.totalorder %v775_v21, %v2810_v32  ;;  %2076 = vmatpush3.msk.msra.mxu1 %vm1002_vm5, %v2191_v34 }
 0x2ad   :  { %2047 = vmatpush3.msk.msra.mxu0 %vm967_vm6, %v2191_v34 }
 0x2ae   :  { %v925_v33 = vpop.permute.xlu1 %924 }
 0x2af   :  { %vm1017_vm7 = vcmp.eq.s32.totalorder %v925_v33, %v2810_v32  ;;  %v820_v35 = vpop.permute.xlu0 %819 }
 0x2b0   :  { %vm982_vm8 = vcmp.eq.s32.totalorder %v820_v35, %v2810_v32  ;;  %2077 = vmatprep.subr.msk.mxu1 %vm1017_vm7, %v2191_v34 }
 0x2b1   :  { %2048 = vmatprep.subr.msk.mxu0 %vm982_vm8, %v2191_v34 }
 0x2b2   :  { %v877_v36 = vpop.permute.xlu1 %876 }
 0x2b3   :  { %vm1001_vm10 = vcmp.eq.s32.totalorder %v877_v36, %v2810_v32  ;;  %v772_v37 = vpop.permute.xlu0 %771 }
 0x2b4   :  { %vm966_vm11 = vcmp.eq.s32.totalorder %v772_v37, %v2810_v32  ;;  %2078 = vmatpush3.msk.msra.mxu1 %vm1001_vm10, %v2191_v34 }
 0x2b5   :  { %2049 = vmatpush3.msk.msra.mxu0 %vm966_vm11, %v2191_v34 }
 0x2b6   :  { %v922_v39 = vpop.permute.xlu1 %921  ;;  %2119 = vmatprep.subr.mxu0 %v2181_v3 }
 0x2b7   :  { %vm1016_vm12 = vcmp.eq.s32.totalorder %v922_v39, %v2810_v32 }
 0x2b8   :  { %2079 = vmatprep.subr.msk.mxu1 %vm1016_vm12, %v2191_v34 }
 0x2ba   :  { %v874_v40 = vpop.permute.xlu1 %873 }
 0x2bb   :  { %vm1000_vm13 = vcmp.eq.s32.totalorder %v874_v40, %v2810_v32 }
 0x2bc   :  { %2080 = vmatpush3.msk.msra.mxu1 %vm1000_vm13, %v2191_v34 }
 0x2be   :  { %v919_v43 = vpop.permute.xlu1 %918 }
 0x2bf   :  { %vm1015_vm14 = vcmp.eq.s32.totalorder %v919_v43, %v2810_v32 }
 0x2c0   :  { %2081 = vmatprep.subr.msk.mxu1 %vm1015_vm14, %v2191_v34 }
 0x2c2   :  { %v871_v45 = vpop.permute.xlu1 %870 }
 0x2c3   :  { %vm999_vm15 = vcmp.eq.s32.totalorder %v871_v45, %v2810_v32 }
 0x2c4   :  { %2082 = vmatpush3.msk.msra.mxu1 %vm999_vm15, %v2191_v34 }
 0x2c6   :  { %v916_v46 = vpop.permute.xlu1 %915 }
 0x2c7   :  { %vm1014_vm1 = vcmp.eq.s32.totalorder %v916_v46, %v2810_v32 }
 0x2c8   :  { %2083 = vmatprep.subr.msk.mxu1 %vm1014_vm1, %v2191_v34 }
 0x2ca   :  { %v868_v47 = vpop.permute.xlu1 %867 }
 0x2cb   :  { %vm998_vm2 = vcmp.eq.s32.totalorder %v868_v47, %v2810_v32  ;;  %v1319_v32 = vld [vmem:[%s3075_s15] sm:$0xff] }
 0x2cc   :  { %2084 = vmatpush3.msk.msra.mxu1 %vm998_vm2, %v2191_v34  ;;  %v1312_v34 = vld [vmem:[%s3076_s14] sm:$0xff] }
 0x2ff   :  { %v629_v48 = vpop.f32.mrf.mxu0 }
 0x301   :  { %v631_v50 = vpop.f32.mrf.mxu0 }
 0x302   :  { %1222 = vmatprep.mubr.f32.mxu0 %v631_v50 }
 0x303   :  { %v700_v51 = vpop.f32.mrf.mxu1  ;;  %1223 = vmatmul.mubr.f32.vlgmr.msra.gmra.mxu0 %v629_v48 }
 0x304   :  { %2137 = vmatprep.mubr.msk.f32.mxu0 %vm2192_vm4, %v2181_v3 }
 0x305   :  { %v702_v52 = vpop.f32.mrf.mxu1 }
 0x306   :  { %1292 = vmatprep.mubr.f32.mxu1 %v702_v52 }
 0x307   :  { %1293 = vmatmul.mubr.f32.vlgmr.msra.gmra.mxu1 %v700_v51 }
 0x308   :  { %2109 = vmatprep.mubr.msk.f32.mxu1 %vm1329_vm3, %v1327_v7 }
 0x3c3   :  { %v2050_v57 = vpop.f32.mrf.mxu0 }
 0x3c5   :  { %v2051_v58 = vpop.f32.mrf.mxu0 }
 0x3c6   :  { %v2052_v44 = vadd.f32 %v2051_v58, %v2050_v57 }
 0x3c7   :  { %v2085_v59 = vpop.f32.mrf.mxu1 }
 0x3c9   :  { %v2086_v60 = vpop.f32.mrf.mxu1 }
 0x3ca   :  { %v2087_v61 = vadd.f32 %v2086_v60, %v2085_v59 }
 0x3cc   :  { %v1295_v0 = vadd.f32 %v2087_v61, %v2052_v44 }
 0x3ce   :  { %1298 = vadd.xlane.f32.xlu0 %v1295_v0  ;;  %v1302_v4 = vmul.f32 %v1295_v0, %v1295_v0 }
 0x3d0   :  { %1303 = vadd.xlane.f32.xlu1 %v1302_v4 }
 0x3e1   :  { %1322 = vperm.xlu1 %2163, %v1319_v32  }
 0x3e4   :  { %1315 = vperm.xlu0 %2164, %v1312_v34   ;;  %v1467_v34 = vld [vmem:[%s3080_s1] sm:$0xff]  ;;  %s2193_s1 = smov 120  }
 0x3e5   :  { %1446 = vperm.xlu1 %2163, %v1438_v5  }
 0x457   :  { %v1299_v8 = vpop.xlane.xlu0 %1298 }
 0x458   :  { %v1301_v10 = vmul.f32 0.0078125, %v1299_v8 }
 0x459   :  { %v1304_v11 = vpop.xlane.xlu1 %1303 }
 0x45a   :  { %v1306_v12 = vmul.f32 %v1301_v10, %v1301_v10  ;;  %v1305_v1 = vmul.f32 0.0078125, %v1304_v11  ;;  %v1308_v14 = vsub.f32 %v1295_v0, %v1301_v10  ;;  %v1561_v10 = vld [vmem:[%s3081_s3] sm:$0xff]  ;;  %s2195_s3 = smov 121  }
 0x45b   :  { %v1554_v11 = vld [vmem:[%s3082_s2] sm:$0xff]  ;;  %s2194_s2 = smov 119  }
 0x45c   :  { %v1307_v13 = vsub.f32 %v1305_v1, %v1306_v12 }
 0x45d   :  { %v1323_v20 = vpop.permute.xlu1 %1322 }
 0x45e   :  { %v1309_v26 = vadd.f32 1e-05, %v1307_v13 }
 0x45f   :  { %v1316_v18 = vpop.permute.xlu0 %1315 }
 0x460   :  { %2167 = vrsqrt.f32 %v1309_v26 }
 0x461   :  { %v1447_v53 = vpop.permute.xlu1 %1446 }
 0x46d   :  { %v2168_v15 = vpop.eup %2167 }
 0x46e   :  { %v1311_v16 = vmul.f32 %v2168_v15, %v1308_v14 }
 0x470   :  { %v1318_v19 = vmul.f32 %v1316_v18, %v1311_v16 }
 0x472   :  { %v1325_v22 = vadd.f32 %v1323_v20, %v1318_v19 }
 0x474   :  { %v1326_v56 = vmax.f32 %v1325_v22, 0.0 }
 0x476   :  { %2107 = vmatprep.subr.mxu1 %v1326_v56 }
 0x477   :  { %2108 = vmatpush3.msra.mxu1 %v1326_v56 }
 0x478   :  { %2110 = vmatmul.mubr.msk.f32.vlgmr.msra.gmra.mxu1 %vm1329_vm3, %v1328_v24  ;;  %2112 = vmatprep.subr.mxu1 %v2181_v3 }
 0x479   :  { %2116 = vmatprep.mubr.msk.f32.mxu1 %vm2192_vm4, %v2181_v3 }
 0x538   :  { %v2111_v63 = vpop.f32.mrf.mxu1 }
 0x539   :  { %1413 = vadd.xlane.f32.xlu0 %v2111_v63  ;;  %v1418_v25 = vmul.f32 %v2111_v63, %v2111_v63 }
 0x53a   :  { %v1402_v2 = vpop.f32.mrf.mxu1 }
 0x53b   :  { %1411 = vadd.xlane.f32.xlu1 %v1402_v2  ;;  %v1417_v27 = vmul.f32 %v1402_v2, %v1402_v2 }
 0x53d   :  { %1421 = vadd.xlane.f32.xlu0 %v1418_v25  ;;  %v82_v25 = vld [vmem:[%s3083_s22] sm:$0xff] }
 0x541   :  { %1419 = vadd.xlane.f32.xlu0 %v1417_v27  ;;  %v2014_v27 = vld [vmem:[%s3083_s22 + $0x8] ss:$0 sm:$0xff] }
 0x54c   :  { %1460 = vperm.xlu1 %2163, %v1452_v54   ;;  %v1616_v54 = vrot.slane %v82_v25, %v2518_v38  ;;  %v1595_v38 = vrot.slane %v82_v25, %v2644_v49 }
 0x550   :  { %1455 = vperm.xlu1 %2163, %v1451_v55  }
 0x557   :  { %1441 = vperm.xlu0 %2164, %v1437_v28  }
 0x5c2   :  { %v1414_v62 = vpop.xlane.xlu0 %1413 }
 0x5c3   :  { %v1416_v30 = vmul.f32 0.0078125, %v1414_v62  ;;  %v1609_v62 = vrot.slane %v82_v25, %v2576_v6 }
 0x5c4   :  { %v1412_v42 = vpop.xlane.xlu1 %1411 }
 0x5c5   :  { %v1426_v23 = vmul.f32 %v1416_v30, %v1416_v30  ;;  %v1415_v21 = vmul.f32 0.0078125, %v1412_v42  ;;  %v1430_v46 = vsub.f32 %v2111_v63, %v1416_v30  ;;  %v1602_v42 = vrot.slane %v82_v25, %v2610_v29 }
 0x5c6   :  { %v1422_v31 = vpop.xlane.xlu0 %1421 }
 0x5c7   :  { %v1424_v33 = vmul.f32 0.0078125, %v1422_v31  ;;  %v1425_v37 = vmul.f32 %v1415_v21, %v1415_v21  ;;  %v1429_v51 = vsub.f32 %v1402_v2, %v1415_v21 }
 0x5c8   :  { %v1461_v50 = vpop.permute.xlu1 %1460 }
 0x5c9   :  { %v1428_v35 = vsub.f32 %v1424_v33, %v1426_v23 }
 0x5ca   :  { %v1420_v36 = vpop.xlane.xlu0 %1419 }
 0x5cb   :  { %v1432_v39 = vadd.f32 1e-05, %v1428_v35  ;;  %v1423_v40 = vmul.f32 0.0078125, %v1420_v36  ;;  %v1588_v36 = vrot.slane %v82_v25, %v2689_v17 }
 0x5cc   :  { %v1456_v0 = vpop.permute.xlu1 %1455 }
 0x5cd   :  { %2169 = vrsqrt.f32 %v1432_v39  ;;  %v1427_v43 = vsub.f32 %v1423_v40, %v1425_v37  ;;  %v1581_v37 = vrot.slane %v82_v25, %v2732_v41  ;;  %v1625_v41 = vld [vmem:[%s3084_s4] sm:$0xff] }
 0x5cf   :  { %v1431_v45 = vadd.f32 1e-05, %v1427_v43  ;;  %v1574_v43 = vrot.slane %v82_v25, %v2767_v9 }
 0x5d1   :  { %2171 = vrsqrt.f32 %v1431_v45 }
 0x5d2   :  { %v1442_v60 = vpop.permute.xlu0 %1441 }
 0x5da   :  { %v2170_v47 = vpop.eup %2169 }
 0x5db   :  { %v1436_v48 = vmul.f32 %v2170_v47, %v1430_v46 }
 0x5dd   :  { %v1450_v52 = vmul.f32 %v1447_v53, %v1436_v48  ;;  %v1719_v48 = vld [vmem:[%s3085_s6] sm:$0xff] }
 0x5de   :  { %v2172_v57 = vpop.eup %2171 }
 0x5df   :  { %v2983_v58 = vadd.f32 %v1461_v50, %v1450_v52  ;;  %v1435_v59 = vmul.f32 %v2172_v57, %v1429_v51  ;;  %v1712_v50 = vld [vmem:[%s3086_s5] sm:$0xff] }
 0x5e0   :  { %v1727_v51 = vld [vmem:[%s3088_s7] sm:$0xff] }
 0x5e1   :  { %v1466_v44 = vmax.f32 %v2983_v58, 0.0  ;;  %v1449_v61 = vmul.f32 %v1442_v60, %v1435_v59 }
 0x5e3   :  { %v2986_v4 = vadd.f32 %v1456_v0, %v1449_v61  ;;  %2113 = vmatpush3.msra.mxu1 %v1466_v44 }
 0x5e4   :  { %2114 = vmatprep.subr.mxu1 %v2181_v3 }
 0x5e5   :  { %v1465_v32 = vmax.f32 %v2986_v4, 0.0 }
 0x5e7   :  { %2115 = vmatpush3.msra.mxu1 %v1465_v32 }
 0x5e8   :  { %2117 = vmatmul.mubr.msk.f32.vlgmr.msra.gmra.mxu1 %vm93_vm0, %v1467_v34 }
 0x5e9   :  { %2142 = vmatprep.mubr.msk.f32.mxu1 %vm1329_vm3, %v1727_v51 }
 0x6a8   :  { %v1537_v5 = vpop.f32.mrf.mxu1 }
 0x6a9   :  { %v1544_v7 = vmul.f32 %v1537_v5, %v1537_v5  ;;  %1541 = vadd.xlane.f32.xlu0 %v1537_v5 }
 0x6aa   :  { %v2118_v8 = vpop.f32.mrf.mxu1 }
 0x6ab   :  { %1545 = vadd.xlane.f32.xlu1 %v1544_v7 }
 0x6bc   :  { %1564 = vperm.xlu1 %2163, %v1561_v10  }
 0x6bf   :  { %1557 = vperm.xlu0 %2164, %v1554_v11  }
 0x732   :  { %v1542_v12 = vpop.xlane.xlu0 %1541 }
 0x733   :  { %v1543_v1 = vmul.f32 0.0078125, %v1542_v12 }
 0x734   :  { %v1546_v13 = vpop.xlane.xlu1 %1545 }
 0x735   :  { %v1548_v26 = vmul.f32 %v1543_v1, %v1543_v1  ;;  %v1547_v14 = vmul.f32 0.0078125, %v1546_v13  ;;  %v1550_v18 = vsub.f32 %v1537_v5, %v1543_v1 }
 0x737   :  { %v1549_v15 = vsub.f32 %v1547_v14, %v1548_v26  ;;  %v1728_v26 = vld [vmem:[%s3088_s7 + $0x8] sm:$0xff] }
 0x738   :  { %v1565_v24 = vpop.permute.xlu1 %1564 }
 0x739   :  { %v1551_v16 = vadd.f32 1e-05, %v1549_v15 }
 0x73a   :  { %v1558_v22 = vpop.permute.xlu0 %1557 }
 0x73b   :  { %2173 = vrsqrt.f32 %v1551_v16 }
 0x748   :  { %v2174_v19 = vpop.eup %2173 }
 0x749   :  { %v1553_v20 = vmul.f32 %v2174_v19, %v1550_v18  ;;  %v1850_v19 = vld [vmem:[%s3089_s9] sm:$0xff] }
 0x74b   :  { %v1560_v56 = vmul.f32 %v1558_v22, %v1553_v20  ;;  %v1851_v20 = vld [vmem:[%s3089_s9 + $0x8] sm:$0xff] }
 0x74c   :  { %v1837_v22 = vld [vmem:[%s3087_s8 + $0x8] sm:$0xff] }
 0x74d   :  { %v1567_v63 = vadd.f32 %v1565_v24, %v1560_v56 }
 0x74f   :  { %v1568_v2 = vmax.f32 %v1567_v63, 0.0 }
 0x751   :  { %1611 = vrot.lane.b32.xlu1 %v1568_v2, %s2193_s1  ;;  %1618 = vrot.lane.b32.xlu0 %v1568_v2, %s2194_s2 }
 0x755   :  { %1597 = vrot.lane.b32.xlu1 %v1568_v2, %s2186_s0  ;;  %1604 = vrot.lane.b32.xlu0 %v1568_v2, %s2195_s3 }
 0x759   :  { %1583 = vrot.lane.b32.xlu1 %v1568_v2, %s2196_s10  ;;  %1590 = vrot.lane.b32.xlu0 %v1568_v2, %s2187_s20 }
 0x75d   :  { %1569 = vrot.lane.b32.xlu1 %v1568_v2, %s2197_s26  ;;  %1576 = vrot.lane.b32.xlu0 %v1568_v2, %s2198_s13 }
 0x7c3   :  { %v1612_v55 = vpop.permute.xlu1 %1611  ;;  %v1619_v28 = vpop.permute.xlu0 %1618 }
 0x7c4   :  { %v1624_v53 = vmul.f32 %v2014_v27, %v1619_v28  ;;  %v1617_v30 = vmul.f32 %v1616_v54, %v1612_v55 }
 0x7c6   :  { %2120 = vmatpush3.msra.mxu0 %v1624_v53 }
 0x7c7   :  { %v1598_v31 = vpop.permute.xlu1 %1597  ;;  %2121 = vmatprep.subr.mxu0 %v2181_v3  ;;  %v1605_v23 = vpop.permute.xlu0 %1604 }
 0x7c8   :  { %v1610_v21 = vmul.f32 %v1609_v62, %v1605_v23  ;;  %2122 = vmatpush3.msra.mxu0 %v1617_v30  ;;  %v1603_v33 = vmul.f32 %v1602_v42, %v1598_v31 }
 0x7c9   :  { %2123 = vmatprep.subr.mxu0 %v2181_v3 }
 0x7ca   :  { %2124 = vmatpush3.msra.mxu0 %v1610_v21 }
 0x7cb   :  { %v1584_v35 = vpop.permute.xlu1 %1583  ;;  %2125 = vmatprep.subr.mxu0 %v2181_v3  ;;  %v1591_v6 = vpop.permute.xlu0 %1590 }
 0x7cc   :  { %2126 = vmatpush3.msra.mxu0 %v1603_v33  ;;  %v1596_v29 = vmul.f32 %v1595_v38, %v1591_v6  ;;  %v1589_v40 = vmul.f32 %v1588_v36, %v1584_v35 }
 0x7cd   :  { %2127 = vmatprep.subr.mxu0 %v2181_v3 }
 0x7ce   :  { %2128 = vmatpush3.msra.mxu0 %v1568_v2 }
 0x7cf   :  { %2129 = vmatprep.subr.mxu0 %v2181_v3  ;;  %v1577_v39 = vpop.permute.xlu0 %1576  ;;  %v1570_v49 = vpop.permute.xlu1 %1569 }
 0x7d0   :  { %2130 = vmatpush3.msra.mxu0 %v1596_v29  ;;  %v1582_v45 = vmul.f32 %v1581_v37, %v1577_v39  ;;  %v1575_v17 = vmul.f32 %v1574_v43, %v1570_v49 }
 0x7d1   :  { %2131 = vmatprep.subr.mxu0 %v2181_v3 }
 0x7d2   :  { %2132 = vmatpush3.msra.mxu0 %v1589_v40 }
 0x7d3   :  { %2133 = vmatprep.subr.mxu0 %v2181_v3 }
 0x7d4   :  { %2134 = vmatpush3.msra.mxu0 %v1582_v45 }
 0x7d5   :  { %2135 = vmatprep.subr.mxu0 %v2181_v3  ;;  %v1836_v3 = vld [vmem:[%s3087_s8] sm:$0xff] }
 0x7d6   :  { %2136 = vmatpush3.msra.mxu0 %v1575_v17 }
 0x7d7   :  { %2138 = vmatmul.mubr.msk.f32.vlgmr.msra.gmra.mxu0 %vm559_vm9, %v1625_v41 }
 0x897   :  { %v1695_v9 = vpop.f32.mrf.mxu0 }
 0x898   :  { %v1702_v46 = vmul.f32 %v1695_v9, %v1695_v9  ;;  %1699 = vadd.xlane.f32.xlu0 %v1695_v9 }
 0x899   :  { %v2139_v47 = vpop.f32.mrf.mxu0 }
 0x89a   :  { %1703 = vadd.xlane.f32.xlu1 %v1702_v46 }
 0x8ab   :  { %1722 = vperm.xlu1 %2163, %v1719_v48  }
 0x8ae   :  { %1715 = vperm.xlu0 %2164, %v1712_v50  }
 0x8af   :  { %1840 = vperm.xlu1 %2163, %v1836_v3  }
 0x921   :  { %v1700_v52 = vpop.xlane.xlu0 %1699 }
 0x922   :  { %v1701_v57 = vmul.f32 0.0078125, %v1700_v52 }
 0x923   :  { %v1704_v59 = vpop.xlane.xlu1 %1703 }
 0x924   :  { %v1706_v60 = vmul.f32 %v1701_v57, %v1701_v57  ;;  %v1705_v61 = vmul.f32 0.0078125, %v1704_v59  ;;  %v1708_v5 = vsub.f32 %v1695_v9, %v1701_v57 }
 0x926   :  { %v1707_v0 = vsub.f32 %v1705_v61, %v1706_v60 }
 0x927   :  { %v1723_v12 = vpop.permute.xlu1 %1722 }
 0x928   :  { %v1709_v34 = vadd.f32 1e-05, %v1707_v0 }
 0x929   :  { %v1716_v10 = vpop.permute.xlu0 %1715 }
 0x92a   :  { %2175 = vrsqrt.f32 %v1709_v34 }
 0x92b   :  { %v1841_v56 = vpop.permute.xlu1 %1840 }
 0x937   :  { %v2176_v7 = vpop.eup %2175 }
 0x938   :  { %v1711_v8 = vmul.f32 %v2176_v7, %v1708_v5 }
 0x93a   :  { %v1718_v11 = vmul.f32 %v1716_v10, %v1711_v8 }
 0x93c   :  { %v1725_v1 = vadd.f32 %v1723_v12, %v1718_v11 }
 0x93e   :  { %v1726_v13 = vmax.f32 %v1725_v1, 0.0 }
 0x940   :  { %2140 = vmatprep.subr.mxu1 %v1726_v13 }
 0x941   :  { %2141 = vmatpush3.msra.mxu1 %v1726_v13 }
 0x942   :  { %2143 = vmatmul.mubr.msk.f32.vlgmr.msra.gmra.mxu1 %vm1329_vm3, %v1728_v26 }
 0xa02   :  { %v2144_v14 = vpop.f32.mrf.mxu1 }
 0xa03   :  { %1812 = vadd.xlane.f32.xlu1 %v2144_v14  ;;  %v1817_v16 = vmul.f32 %v2144_v14, %v2144_v14 }
 0xa04   :  { %v1801_v15 = vpop.f32.mrf.mxu1 }
 0xa05   :  { %1810 = vadd.xlane.f32.xlu0 %v1801_v15  ;;  %v1816_v18 = vmul.f32 %v1801_v15, %v1801_v15 }
 0xa09   :  { %1820 = vadd.xlane.f32.xlu0 %v1817_v16 }
 0xa0d   :  { %1818 = vadd.xlane.f32.xlu0 %v1816_v18 }
 0xa14   :  { %1854 = vperm.xlu1 %2163, %v1850_v19  }
 0xa18   :  { %1859 = vperm.xlu1 %2163, %v1851_v20  }
 0xa23   :  { %1845 = vperm.xlu0 %2164, %v1837_v22  }
 0xa8c   :  { %v1813_v24 = vpop.xlane.xlu1 %1812 }
 0xa8d   :  { %v1815_v2 = vmul.f32 0.0078125, %v1813_v24 }
 0xa8e   :  { %v1811_v63 = vpop.xlane.xlu0 %1810 }
 0xa8f   :  { %v1825_v27 = vmul.f32 %v1815_v2, %v1815_v2  ;;  %v1814_v54 = vmul.f32 0.0078125, %v1811_v63  ;;  %v1829_v33 = vsub.f32 %v2144_v14, %v1815_v2 }
 0xa90   :  { %v1855_v21 = vpop.permute.xlu1 %1854 }
 0xa91   :  { %v1824_v62 = vmul.f32 %v1814_v54, %v1814_v54  ;;  %v1828_v36 = vsub.f32 %v1801_v15, %v1814_v54 }
 0xa92   :  { %v1821_v25 = vpop.xlane.xlu0 %1820 }
 0xa93   :  { %v1823_v55 = vmul.f32 0.0078125, %v1821_v25 }
 0xa94   :  { %v1860_v39 = vpop.permute.xlu1 %1859 }
 0xa95   :  { %v1827_v28 = vsub.f32 %v1823_v55, %v1825_v27 }
 0xa96   :  { %v1819_v53 = vpop.xlane.xlu0 %1818 }
 0xa97   :  { %v1831_v30 = vadd.f32 1e-05, %v1827_v28  ;;  %v1822_v42 = vmul.f32 0.0078125, %v1819_v53 }
 0xa99   :  { %2177 = vrsqrt.f32 %v1831_v30  ;;  %v1826_v31 = vsub.f32 %v1822_v42, %v1824_v62 }
 0xa9b   :  { %v1830_v23 = vadd.f32 1e-05, %v1826_v31 }
 0xa9d   :  { %2179 = vrsqrt.f32 %v1830_v23 }
 0xa9e   :  { %v1846_v6 = vpop.permute.xlu0 %1845 }
 0xaa6   :  { %v2178_v38 = vpop.eup %2177 }
 0xaa7   :  { %v1835_v35 = vmul.f32 %v2178_v38, %v1829_v33 }
 0xaa9   :  { %v1849_v29 = vmul.f32 %v1846_v6, %v1835_v35 }
 0xaaa   :  { %v2180_v37 = vpop.eup %2179 }
 0xaab   :  { %v1834_v40 = vmul.f32 %v2180_v37, %v1828_v36  ;;  %v1863_v43 = vadd.f32 %v1860_v39, %v1849_v29 }
 0xaad   :  { %v1848_v49 = vmul.f32 %v1841_v56, %v1834_v40  ;;  %v1865_v45 = vadd.f32 %v1863_v43, %v1466_v44 }
 0xaaf   :  { %v1862_v17 = vadd.f32 %v1855_v21, %v1848_v49  ;;  %v1867_v41 = vmax.f32 %v1865_v45, 0.0 }
 0xab1   :  { %v1864_v9 = vadd.f32 %v1862_v17, %v1465_v32  ;;  %1869 = vst [vmem:[%s3090_s23 + $0x8] sm:$0xff] %v1867_v41 }
 0xab3   :  { %v1866_v46 = vmax.f32 %v1864_v9, 0.0 }
 0xab5   :  { %1868 = vst [vmem:[%s3090_s23] sm:$0xff] %v1866_v46 }

</bundles_post_ra>
